<compile_context>
chip_gen: v7x
topology: tpu7x:2x2x1
jax: 0.10.0
libtpu: 0.0.40
codegen_flags: <defaults>
</compile_context>

<pallas_src>
import jax
import jax.numpy as jnp
import numpy as np
from jax import lax
from jax.experimental import pallas as pl
from jax.experimental.pallas import tpu as pltpu

INFTY = 1000000.0


def _comparator_kernel(src_ref, ref_ref, mt_ref,
                       pw_ref, pb_ref, w1_ref, b1_ref, w2_ref, b2_ref,
                       out_ref):
    D = src_ref.shape[2]
    pw = pw_ref[...].astype(jnp.float32)       # (1, D)
    pb = pb_ref[0, 0].astype(jnp.float32)      # scalar

    def pool(emb_ref):
        # Upcast once at load; HBM traffic stays at the input dtype (bf16 path supported).
        emb = emb_ref[...].astype(jnp.float32)                      # (TB, S, D)
        # pooler: Dropout(p=0) -> Linear(D, 1), squeeze(-1)
        preds = jnp.sum(emb * pw[None, :, :], axis=-1) + pb         # (TB, S)
        # mask = 1 unless the whole feature row is exactly zero (cheap abs-max reduction)
        mask = (jnp.max(jnp.abs(emb), axis=-1) > 0.0).astype(jnp.float32)
        preds = preds - (1.0 - mask) * INFTY
        # softmax over the sequence axis; reciprocal goes to the EUP slot
        m = jnp.max(preds, axis=-1, keepdims=True)
        e = jnp.exp(preds - m)
        w = e * pl.reciprocal(jnp.sum(e, axis=-1, keepdims=True), approx=True)
        # einsum('bsd,bs->bd')
        return jnp.sum(emb * w[:, :, None], axis=1)                 # (TB, D)

    def normalize(x):  # F.normalize: x / max(||x||_2, 1e-12)
        ss = jnp.sum(x * x, axis=-1, keepdims=True)
        return x * lax.rsqrt(jnp.maximum(ss, 1e-24))

    src = normalize(pool(src_ref))
    ref = normalize(pool(ref_ref))
    mt = normalize(pool(mt_ref))

    # "comet" input form: cat([ref, mt, src*mt, ref*mt, |mt-src|, |mt-ref|], -1) @ W1 + b1
    # implemented as a sum of six (TB,D)@(D,H) matmuls against static slices of W1.
    feats = (ref, mt, src * mt, ref * mt, jnp.abs(mt - src), jnp.abs(mt - ref))
    acc = b1_ref[...].astype(jnp.float32)                           # (1, H), broadcasts
    for k, f in enumerate(feats):
        acc = acc + jnp.dot(f, w1_ref[k * D:(k + 1) * D, :],
                            preferred_element_type=jnp.float32)
    h = jnp.tanh(acc)                                               # activation == TANH

    out = jnp.tanh(jnp.dot(h, w2_ref[...], preferred_element_type=jnp.float32)
                   + b2_ref[...])                                   # output_act == True
    out_ref[...] = out.astype(out_ref.dtype)


def comparator_forward(src, ref, mt, params, *, block_b=None):
    B, S, D = src.shape
    H = params["w1"].shape[1]
    O = params["w2"].shape[1]
    itemsize = jnp.dtype(src.dtype).itemsize

    # Lane-dense output slab: pad the output head to a multiple of 128 lanes, slice outside.
    O_pad = 128 * pl.cdiv(O, 128)
    w2p = jnp.pad(params["w2"].astype(jnp.float32), ((0, 0), (0, O_pad - O)))
    b2p = jnp.pad(params["b2"].astype(jnp.float32), ((0, 0), (0, O_pad - O)))

    # Batch tile: keep (2 pipeline buffers x 3 inputs x TB*S*D*itemsize) well under the
    # 32 MiB scoped VMEM default (v7x-safe; v5e/v6e have more headroom).
    if block_b is None:
        budget = 8 * 1024 * 1024                    # per-buffer input budget (x2 buffers = 16 MiB)
        tb = max(1, budget // (3 * S * D * itemsize))
        block_b = B if tb >= B else max(8, (tb // 8) * 8)
    block_b = min(block_b, B)
    if block_b < B and block_b % 8 != 0:            # output block sublane alignment
        block_b = max(8, (block_b // 8) * 8)
    grid = (pl.cdiv(B, block_b),)

    def seq_spec():
        return pl.BlockSpec((block_b, S, D), lambda i: (i, 0, 0))

    def full_spec(shp):
        return pl.BlockSpec(shp, lambda i, _s=shp: (0,) * len(_s))

    cost = pl.CostEstimate(
        flops=int(3 * 4 * B * S * D + 2 * B * 6 * D * H + 2 * B * H * O_pad),
        transcendentals=int(3 * B * S + B * (H + O_pad)),
        bytes_accessed=int(3 * B * S * D * itemsize
                           + (6 * D * H + H * O_pad + D + H + O_pad + 2) * 4
                           + B * O_pad * 4),
    )

    out = pl.pallas_call(
        _comparator_kernel,
        out_shape=jax.ShapeDtypeStruct((B, O_pad), jnp.float32),
        grid=grid,
        in_specs=[seq_spec(), seq_spec(), seq_spec(),
                  full_spec((1, D)), full_spec((1, 1)),
                  full_spec((6 * D, H)), full_spec((1, H)),
                  full_spec((H, O_pad)), full_spec((1, O_pad))],
        out_specs=pl.BlockSpec((block_b, O_pad), lambda i: (i, 0)),
        compiler_params=pltpu.CompilerParams(
            dimension_semantics=("parallel",),
            vmem_limit_bytes=32 * 1024 * 1024),
        cost_estimate=cost,
    )(src, ref, mt,
      params["pw"].astype(jnp.float32), params["pb"].astype(jnp.float32),
      params["w1"].astype(jnp.float32), params["b1"].astype(jnp.float32),
      w2p, b2p)
    return out[:, :O]


def comparator_reference(src, ref, mt, params):
    """Pure-JAX reference (mirrors the torch forward) for validation."""
    def pool(emb):
        preds = jnp.einsum("bsd,d->bs", emb, params["pw"][0]) + params["pb"][0, 0]
        mask = jnp.any(emb != 0, axis=-1).astype(jnp.float32)
        preds = preds - (1.0 - mask) * INFTY
        w = jax.nn.softmax(preds, axis=-1)
        return jnp.einsum("bsd,bs->bd", emb, w)

    def norm(x):
        return x / jnp.maximum(jnp.linalg.norm(x, axis=-1, keepdims=True), 1e-12)

    s, r, m = norm(pool(src)), norm(pool(ref)), norm(pool(mt))
    feat = jnp.concatenate([r, m, s * m, r * m, jnp.abs(m - s), jnp.abs(m - r)], axis=-1)
    h = jnp.tanh(feat @ params["w1"] + params["b1"])
    return jnp.tanh(h @ params["w2"] + params["b2"])


if __name__ == "__main__":
    B, S, D, H, O = 16, 8, 32, 32, 8   # batch, seq, idim, nhid[0], odim

    key = jax.random.PRNGKey(0)
    ks = jax.random.split(key, 9)

    src = jax.random.normal(ks[0], (B, S, D), jnp.float32)
    ref = jax.random.normal(ks[1], (B, S, D), jnp.float32)
    mt = jax.random.normal(ks[2], (B, S, D), jnp.float32)
    # exercise the all-zero-row mask / -INFTY softmax path
    mt = mt.at[0, 3, :].set(0.0)
    src = src.at[5, 0, :].set(0.0)

    params = {
        # pooler: Linear(D, 1) -> weight (1, D), bias (1, 1)
        "pw": 0.1 * jax.random.normal(ks[3], (1, D), jnp.float32),
        "pb": 0.1 * jax.random.normal(ks[4], (1, 1), jnp.float32),
        # mlp: Linear(6*D, H) + Tanh + Linear(H, O) + Tanh  (weights in (in, out) layout)
        "w1": 0.1 * jax.random.normal(ks[5], (6 * D, H), jnp.float32),
        "b1": 0.1 * jax.random.normal(ks[6], (1, H), jnp.float32),
        "w2": 0.1 * jax.random.normal(ks[7], (H, O), jnp.float32),
        "b2": 0.1 * jax.random.normal(ks[8], (1, O), jnp.float32),
    }

    expected = jax.block_until_ready(comparator_reference(src, ref, mt, params))

    # f32 path, blocked over batch (grid=(2,)) to exercise the pipeline.
    out = jax.block_until_ready(comparator_forward(src, ref, mt, params, block_b=8))
    np.testing.assert_allclose(np.asarray(out), np.asarray(expected), rtol=5e-3, atol=5e-3)

    # bf16 input path (halves HBM traffic on v6e/v7x); f32 accumulation inside the kernel.
    out_bf16 = jax.block_until_ready(
        comparator_forward(src.astype(jnp.bfloat16), ref.astype(jnp.bfloat16),
                           mt.astype(jnp.bfloat16), params, block_b=8))
    np.testing.assert_allclose(np.asarray(out_bf16), np.asarray(expected), rtol=0.1, atol=0.1)

    print("KERNEL_OK")
</pallas_src>

<mosaic_0001>
module attributes {stable_mosaic.version = 11 : i64} {
  func.func @_comparator_kernel(%arg0: i32, %arg1: memref<8x8x32xf32, #tpu.memory_space<vmem>>, %arg2: memref<8x8x32xf32, #tpu.memory_space<vmem>>, %arg3: memref<8x8x32xf32, #tpu.memory_space<vmem>>, %arg4: memref<1x32xf32, #tpu.memory_space<vmem>>, %arg5: memref<1x1xf32, #tpu.memory_space<vmem>>, %arg6: memref<192x32xf32, #tpu.memory_space<vmem>>, %arg7: memref<1x32xf32, #tpu.memory_space<vmem>>, %arg8: memref<32x128xf32, #tpu.memory_space<vmem>>, %arg9: memref<1x128xf32, #tpu.memory_space<vmem>>, %arg10: memref<8x128xf32, #tpu.memory_space<vmem>>) attributes {dimension_semantics = [#tpu.dimension_semantics<parallel>], iteration_bounds = array<i64: 2>, scalar_prefetch = 0 : i64, scratch_operands = 0 : i64, tpu.core_type = #tpu.core_type<tc>, window_params = [{transform_indices = @transform_0, window_bounds = array<i64: 8, 8, 32>}, {transform_indices = @transform_1, window_bounds = array<i64: 8, 8, 32>}, {transform_indices = @transform_2, window_bounds = array<i64: 8, 8, 32>}, {pipeline_mode = #tpu.pipeline_mode<synchronous>, transform_indices = @transform_3, window_bounds = array<i64: 1, 32>}, {pipeline_mode = #tpu.pipeline_mode<synchronous>, transform_indices = @transform_4, window_bounds = array<i64: 1, 1>}, {pipeline_mode = #tpu.pipeline_mode<synchronous>, transform_indices = @transform_5, window_bounds = array<i64: 192, 32>}, {pipeline_mode = #tpu.pipeline_mode<synchronous>, transform_indices = @transform_6, window_bounds = array<i64: 1, 32>}, {pipeline_mode = #tpu.pipeline_mode<synchronous>, transform_indices = @transform_7, window_bounds = array<i64: 32, 128>}, {pipeline_mode = #tpu.pipeline_mode<synchronous>, transform_indices = @transform_8, window_bounds = array<i64: 1, 128>}, {transform_indices = @transform_9, window_bounds = array<i64: 8, 128>}]} {
    %c0 = arith.constant 0 : index
    %c0_0 = arith.constant 0 : index
    %0 = vector.load %arg4[%c0, %c0_0] : memref<1x32xf32, #tpu.memory_space<vmem>>, vector<1x32xf32>
    %c0_1 = arith.constant 0 : index
    %c0_2 = arith.constant 0 : index
    %1 = vector.load %arg5[%c0_1, %c0_2] : memref<1x1xf32, #tpu.memory_space<vmem>>, vector<1x1xf32>
    %2 = vector.extract %1[0, 0] : f32 from vector<1x1xf32>
    %c0_3 = arith.constant 0 : index
    %c0_4 = arith.constant 0 : index
    %c0_5 = arith.constant 0 : index
    %3 = vector.load %arg1[%c0_3, %c0_4, %c0_5] : memref<8x8x32xf32, #tpu.memory_space<vmem>>, vector<8x8x32xf32>
    %4 = vector.shape_cast %0 : vector<1x32xf32> to vector<1x1x32xf32>
    %5 = vector.broadcast %4 : vector<1x1x32xf32> to vector<8x8x32xf32>
    %6 = arith.mulf %3, %5 : vector<8x8x32xf32>
    %cst = arith.constant dense<0.000000e+00> : vector<8x8xf32>
    %7 = vector.multi_reduction <add>, %6, %cst [2] : vector<8x8x32xf32> to vector<8x8xf32>
    %8 = vector.broadcast %2 : f32 to vector<8x8xf32>
    %9 = arith.addf %7, %8 : vector<8x8xf32>
    %10 = math.absf %3 : vector<8x8x32xf32>
    %cst_6 = arith.constant dense<0xFF800000> : vector<8x8xf32>
    %11 = vector.multi_reduction <maximumf>, %10, %cst_6 [2] : vector<8x8x32xf32> to vector<8x8xf32>
    %cst_7 = arith.constant 0.000000e+00 : f32
    %12 = vector.broadcast %cst_7 : f32 to vector<8x8xf32>
    %13 = arith.cmpf ogt, %11, %12 : vector<8x8xf32>
    %14 = arith.extui %13 : vector<8x8xi1> to vector<8x8xi32>
    %15 = arith.sitofp %14 : vector<8x8xi32> to vector<8x8xf32>
    %cst_8 = arith.constant 1.000000e+00 : f32
    %16 = vector.broadcast %cst_8 : f32 to vector<8x8xf32>
    %17 = arith.subf %16, %15 : vector<8x8xf32>
    %cst_9 = arith.constant 1.000000e+06 : f32
    %18 = vector.broadcast %cst_9 : f32 to vector<8x8xf32>
    %19 = arith.mulf %17, %18 : vector<8x8xf32>
    %20 = arith.subf %9, %19 : vector<8x8xf32>
    %cst_10 = arith.constant dense<0xFF800000> : vector<8xf32>
    %21 = vector.multi_reduction <maximumf>, %20, %cst_10 [1] : vector<8x8xf32> to vector<8xf32>
    %22 = vector.shape_cast %21 : vector<8xf32> to vector<8x1xf32>
    %23 = vector.broadcast %22 : vector<8x1xf32> to vector<8x8xf32>
    %24 = arith.subf %20, %23 : vector<8x8xf32>
    %25 = math.exp %24 : vector<8x8xf32>
    %cst_11 = arith.constant dense<0.000000e+00> : vector<8xf32>
    %26 = vector.multi_reduction <add>, %25, %cst_11 [1] : vector<8x8xf32> to vector<8xf32>
    %27 = vector.shape_cast %26 : vector<8xf32> to vector<8x1xf32>
    %28 = tpu.reciprocal %27 {approx = true} : vector<8x1xf32> -> vector<8x1xf32>
    %29 = vector.broadcast %28 : vector<8x1xf32> to vector<8x8xf32>
    %30 = arith.mulf %25, %29 : vector<8x8xf32>
    %31 = vector.shape_cast %30 : vector<8x8xf32> to vector<8x8x1xf32>
    %32 = vector.broadcast %31 : vector<8x8x1xf32> to vector<8x8x32xf32>
    %33 = arith.mulf %3, %32 : vector<8x8x32xf32>
    %cst_12 = arith.constant dense<0.000000e+00> : vector<8x32xf32>
    %34 = vector.multi_reduction <add>, %33, %cst_12 [1] : vector<8x8x32xf32> to vector<8x32xf32>
    %35 = arith.mulf %34, %34 : vector<8x32xf32>
    %cst_13 = arith.constant dense<0.000000e+00> : vector<8xf32>
    %36 = vector.multi_reduction <add>, %35, %cst_13 [1] : vector<8x32xf32> to vector<8xf32>
    %37 = vector.shape_cast %36 : vector<8xf32> to vector<8x1xf32>
    %cst_14 = arith.constant 1.000000e-24 : f32
    %38 = vector.broadcast %cst_14 : f32 to vector<8x1xf32>
    %39 = arith.maximumf %37, %38 : vector<8x1xf32>
    %40 = math.rsqrt %39 : vector<8x1xf32>
    %41 = vector.broadcast %40 : vector<8x1xf32> to vector<8x32xf32>
    %42 = arith.mulf %34, %41 : vector<8x32xf32>
    %c0_15 = arith.constant 0 : index
    %c0_16 = arith.constant 0 : index
    %c0_17 = arith.constant 0 : index
    %43 = vector.load %arg2[%c0_15, %c0_16, %c0_17] : memref<8x8x32xf32, #tpu.memory_space<vmem>>, vector<8x8x32xf32>
    %44 = vector.shape_cast %0 : vector<1x32xf32> to vector<1x1x32xf32>
    %45 = vector.broadcast %44 : vector<1x1x32xf32> to vector<8x8x32xf32>
    %46 = arith.mulf %43, %45 : vector<8x8x32xf32>
    %cst_18 = arith.constant dense<0.000000e+00> : vector<8x8xf32>
    %47 = vector.multi_reduction <add>, %46, %cst_18 [2] : vector<8x8x32xf32> to vector<8x8xf32>
    %48 = vector.broadcast %2 : f32 to vector<8x8xf32>
    %49 = arith.addf %47, %48 : vector<8x8xf32>
    %50 = math.absf %43 : vector<8x8x32xf32>
    %cst_19 = arith.constant dense<0xFF800000> : vector<8x8xf32>
    %51 = vector.multi_reduction <maximumf>, %50, %cst_19 [2] : vector<8x8x32xf32> to vector<8x8xf32>
    %cst_20 = arith.constant 0.000000e+00 : f32
    %52 = vector.broadcast %cst_20 : f32 to vector<8x8xf32>
    %53 = arith.cmpf ogt, %51, %52 : vector<8x8xf32>
    %54 = arith.extui %53 : vector<8x8xi1> to vector<8x8xi32>
    %55 = arith.sitofp %54 : vector<8x8xi32> to vector<8x8xf32>
    %cst_21 = arith.constant 1.000000e+00 : f32
    %56 = vector.broadcast %cst_21 : f32 to vector<8x8xf32>
    %57 = arith.subf %56, %55 : vector<8x8xf32>
    %cst_22 = arith.constant 1.000000e+06 : f32
    %58 = vector.broadcast %cst_22 : f32 to vector<8x8xf32>
    %59 = arith.mulf %57, %58 : vector<8x8xf32>
    %60 = arith.subf %49, %59 : vector<8x8xf32>
    %cst_23 = arith.constant dense<0xFF800000> : vector<8xf32>
    %61 = vector.multi_reduction <maximumf>, %60, %cst_23 [1] : vector<8x8xf32> to vector<8xf32>
    %62 = vector.shape_cast %61 : vector<8xf32> to vector<8x1xf32>
    %63 = vector.broadcast %62 : vector<8x1xf32> to vector<8x8xf32>
    %64 = arith.subf %60, %63 : vector<8x8xf32>
    %65 = math.exp %64 : vector<8x8xf32>
    %cst_24 = arith.constant dense<0.000000e+00> : vector<8xf32>
    %66 = vector.multi_reduction <add>, %65, %cst_24 [1] : vector<8x8xf32> to vector<8xf32>
    %67 = vector.shape_cast %66 : vector<8xf32> to vector<8x1xf32>
    %68 = tpu.reciprocal %67 {approx = true} : vector<8x1xf32> -> vector<8x1xf32>
    %69 = vector.broadcast %68 : vector<8x1xf32> to vector<8x8xf32>
    %70 = arith.mulf %65, %69 : vector<8x8xf32>
    %71 = vector.shape_cast %70 : vector<8x8xf32> to vector<8x8x1xf32>
    %72 = vector.broadcast %71 : vector<8x8x1xf32> to vector<8x8x32xf32>
    %73 = arith.mulf %43, %72 : vector<8x8x32xf32>
    %cst_25 = arith.constant dense<0.000000e+00> : vector<8x32xf32>
    %74 = vector.multi_reduction <add>, %73, %cst_25 [1] : vector<8x8x32xf32> to vector<8x32xf32>
    %75 = arith.mulf %74, %74 : vector<8x32xf32>
    %cst_26 = arith.constant dense<0.000000e+00> : vector<8xf32>
    %76 = vector.multi_reduction <add>, %75, %cst_26 [1] : vector<8x32xf32> to vector<8xf32>
    %77 = vector.shape_cast %76 : vector<8xf32> to vector<8x1xf32>
    %cst_27 = arith.constant 1.000000e-24 : f32
    %78 = vector.broadcast %cst_27 : f32 to vector<8x1xf32>
    %79 = arith.maximumf %77, %78 : vector<8x1xf32>
    %80 = math.rsqrt %79 : vector<8x1xf32>
    %81 = vector.broadcast %80 : vector<8x1xf32> to vector<8x32xf32>
    %82 = arith.mulf %74, %81 : vector<8x32xf32>
    %c0_28 = arith.constant 0 : index
    %c0_29 = arith.constant 0 : index
    %c0_30 = arith.constant 0 : index
    %83 = vector.load %arg3[%c0_28, %c0_29, %c0_30] : memref<8x8x32xf32, #tpu.memory_space<vmem>>, vector<8x8x32xf32>
    %84 = vector.shape_cast %0 : vector<1x32xf32> to vector<1x1x32xf32>
    %85 = vector.broadcast %84 : vector<1x1x32xf32> to vector<8x8x32xf32>
    %86 = arith.mulf %83, %85 : vector<8x8x32xf32>
    %cst_31 = arith.constant dense<0.000000e+00> : vector<8x8xf32>
    %87 = vector.multi_reduction <add>, %86, %cst_31 [2] : vector<8x8x32xf32> to vector<8x8xf32>
    %88 = vector.broadcast %2 : f32 to vector<8x8xf32>
    %89 = arith.addf %87, %88 : vector<8x8xf32>
    %90 = math.absf %83 : vector<8x8x32xf32>
    %cst_32 = arith.constant dense<0xFF800000> : vector<8x8xf32>
    %91 = vector.multi_reduction <maximumf>, %90, %cst_32 [2] : vector<8x8x32xf32> to vector<8x8xf32>
    %cst_33 = arith.constant 0.000000e+00 : f32
    %92 = vector.broadcast %cst_33 : f32 to vector<8x8xf32>
    %93 = arith.cmpf ogt, %91, %92 : vector<8x8xf32>
    %94 = arith.extui %93 : vector<8x8xi1> to vector<8x8xi32>
    %95 = arith.sitofp %94 : vector<8x8xi32> to vector<8x8xf32>
    %cst_34 = arith.constant 1.000000e+00 : f32
    %96 = vector.broadcast %cst_34 : f32 to vector<8x8xf32>
    %97 = arith.subf %96, %95 : vector<8x8xf32>
    %cst_35 = arith.constant 1.000000e+06 : f32
    %98 = vector.broadcast %cst_35 : f32 to vector<8x8xf32>
    %99 = arith.mulf %97, %98 : vector<8x8xf32>
    %100 = arith.subf %89, %99 : vector<8x8xf32>
    %cst_36 = arith.constant dense<0xFF800000> : vector<8xf32>
    %101 = vector.multi_reduction <maximumf>, %100, %cst_36 [1] : vector<8x8xf32> to vector<8xf32>
    %102 = vector.shape_cast %101 : vector<8xf32> to vector<8x1xf32>
    %103 = vector.broadcast %102 : vector<8x1xf32> to vector<8x8xf32>
    %104 = arith.subf %100, %103 : vector<8x8xf32>
    %105 = math.exp %104 : vector<8x8xf32>
    %cst_37 = arith.constant dense<0.000000e+00> : vector<8xf32>
    %106 = vector.multi_reduction <add>, %105, %cst_37 [1] : vector<8x8xf32> to vector<8xf32>
    %107 = vector.shape_cast %106 : vector<8xf32> to vector<8x1xf32>
    %108 = tpu.reciprocal %107 {approx = true} : vector<8x1xf32> -> vector<8x1xf32>
    %109 = vector.broadcast %108 : vector<8x1xf32> to vector<8x8xf32>
    %110 = arith.mulf %105, %109 : vector<8x8xf32>
    %111 = vector.shape_cast %110 : vector<8x8xf32> to vector<8x8x1xf32>
    %112 = vector.broadcast %111 : vector<8x8x1xf32> to vector<8x8x32xf32>
    %113 = arith.mulf %83, %112 : vector<8x8x32xf32>
    %cst_38 = arith.constant dense<0.000000e+00> : vector<8x32xf32>
    %114 = vector.multi_reduction <add>, %113, %cst_38 [1] : vector<8x8x32xf32> to vector<8x32xf32>
    %115 = arith.mulf %114, %114 : vector<8x32xf32>
    %cst_39 = arith.constant dense<0.000000e+00> : vector<8xf32>
    %116 = vector.multi_reduction <add>, %115, %cst_39 [1] : vector<8x32xf32> to vector<8xf32>
    %117 = vector.shape_cast %116 : vector<8xf32> to vector<8x1xf32>
    %cst_40 = arith.constant 1.000000e-24 : f32
    %118 = vector.broadcast %cst_40 : f32 to vector<8x1xf32>
    %119 = arith.maximumf %117, %118 : vector<8x1xf32>
    %120 = math.rsqrt %119 : vector<8x1xf32>
    %121 = vector.broadcast %120 : vector<8x1xf32> to vector<8x32xf32>
    %122 = arith.mulf %114, %121 : vector<8x32xf32>
    %123 = arith.mulf %42, %122 : vector<8x32xf32>
    %124 = arith.mulf %82, %122 : vector<8x32xf32>
    %125 = arith.subf %122, %42 : vector<8x32xf32>
    %126 = math.absf %125 : vector<8x32xf32>
    %127 = arith.subf %122, %82 : vector<8x32xf32>
    %128 = math.absf %127 : vector<8x32xf32>
    %c0_41 = arith.constant 0 : index
    %c0_42 = arith.constant 0 : index
    %129 = vector.load %arg7[%c0_41, %c0_42] : memref<1x32xf32, #tpu.memory_space<vmem>>, vector<1x32xf32>
    %c0_43 = arith.constant 0 : index
    %c0_44 = arith.constant 0 : index
    %130 = vector.load %arg6[%c0_43, %c0_44] : memref<192x32xf32, #tpu.memory_space<vmem>>, vector<32x32xf32>
    %cst_45 = arith.constant dense<0.000000e+00> : vector<8x32xf32>
    %131 = tpu.matmul %82, %130, %cst_45 {dimension_numbers = #tpu.dot_dimension_numbers<[1], [0], [0], [1], [0, 0, 1, 1], [], []>} : vector<8x32xf32>, vector<32x32xf32>, vector<8x32xf32> -> vector<8x32xf32>
    %132 = vector.broadcast %129 : vector<1x32xf32> to vector<8x32xf32>
    %133 = arith.addf %132, %131 : vector<8x32xf32>
    %c32 = arith.constant 32 : index
    %c0_46 = arith.constant 0 : index
    %134 = vector.load %arg6[%c32, %c0_46] : memref<192x32xf32, #tpu.memory_space<vmem>>, vector<32x32xf32>
    %cst_47 = arith.constant dense<0.000000e+00> : vector<8x32xf32>
    %135 = tpu.matmul %122, %134, %cst_47 {dimension_numbers = #tpu.dot_dimension_numbers<[1], [0], [0], [1], [0, 0, 1, 1], [], []>} : vector<8x32xf32>, vector<32x32xf32>, vector<8x32xf32> -> vector<8x32xf32>
    %136 = arith.addf %133, %135 : vector<8x32xf32>
    %c64 = arith.constant 64 : index
    %c0_48 = arith.constant 0 : index
    %137 = vector.load %arg6[%c64, %c0_48] : memref<192x32xf32, #tpu.memory_space<vmem>>, vector<32x32xf32>
    %cst_49 = arith.constant dense<0.000000e+00> : vector<8x32xf32>
    %138 = tpu.matmul %123, %137, %cst_49 {dimension_numbers = #tpu.dot_dimension_numbers<[1], [0], [0], [1], [0, 0, 1, 1], [], []>} : vector<8x32xf32>, vector<32x32xf32>, vector<8x32xf32> -> vector<8x32xf32>
    %139 = arith.addf %136, %138 : vector<8x32xf32>
    %c96 = arith.constant 96 : index
    %c0_50 = arith.constant 0 : index
    %140 = vector.load %arg6[%c96, %c0_50] : memref<192x32xf32, #tpu.memory_space<vmem>>, vector<32x32xf32>
    %cst_51 = arith.constant dense<0.000000e+00> : vector<8x32xf32>
    %141 = tpu.matmul %124, %140, %cst_51 {dimension_numbers = #tpu.dot_dimension_numbers<[1], [0], [0], [1], [0, 0, 1, 1], [], []>} : vector<8x32xf32>, vector<32x32xf32>, vector<8x32xf32> -> vector<8x32xf32>
    %142 = arith.addf %139, %141 : vector<8x32xf32>
    %c128 = arith.constant 128 : index
    %c0_52 = arith.constant 0 : index
    %143 = vector.load %arg6[%c128, %c0_52] : memref<192x32xf32, #tpu.memory_space<vmem>>, vector<32x32xf32>
    %cst_53 = arith.constant dense<0.000000e+00> : vector<8x32xf32>
    %144 = tpu.matmul %126, %143, %cst_53 {dimension_numbers = #tpu.dot_dimension_numbers<[1], [0], [0], [1], [0, 0, 1, 1], [], []>} : vector<8x32xf32>, vector<32x32xf32>, vector<8x32xf32> -> vector<8x32xf32>
    %145 = arith.addf %142, %144 : vector<8x32xf32>
    %c160 = arith.constant 160 : index
    %c0_54 = arith.constant 0 : index
    %146 = vector.load %arg6[%c160, %c0_54] : memref<192x32xf32, #tpu.memory_space<vmem>>, vector<32x32xf32>
    %cst_55 = arith.constant dense<0.000000e+00> : vector<8x32xf32>
    %147 = tpu.matmul %128, %146, %cst_55 {dimension_numbers = #tpu.dot_dimension_numbers<[1], [0], [0], [1], [0, 0, 1, 1], [], []>} : vector<8x32xf32>, vector<32x32xf32>, vector<8x32xf32> -> vector<8x32xf32>
    %148 = arith.addf %145, %147 : vector<8x32xf32>
    %149 = math.tanh %148 : vector<8x32xf32>
    %c0_56 = arith.constant 0 : index
    %c0_57 = arith.constant 0 : index
    %150 = vector.load %arg8[%c0_56, %c0_57] : memref<32x128xf32, #tpu.memory_space<vmem>>, vector<32x128xf32>
    %cst_58 = arith.constant dense<0.000000e+00> : vector<8x128xf32>
    %151 = tpu.matmul %149, %150, %cst_58 {dimension_numbers = #tpu.dot_dimension_numbers<[1], [0], [0], [1], [0, 0, 1, 1], [], []>} : vector<8x32xf32>, vector<32x128xf32>, vector<8x128xf32> -> vector<8x128xf32>
    %c0_59 = arith.constant 0 : index
    %c0_60 = arith.constant 0 : index
    %152 = vector.load %arg9[%c0_59, %c0_60] : memref<1x128xf32, #tpu.memory_space<vmem>>, vector<1x128xf32>
    %153 = vector.broadcast %152 : vector<1x128xf32> to vector<8x128xf32>
    %154 = arith.addf %151, %153 : vector<8x128xf32>
    %155 = math.tanh %154 : vector<8x128xf32>
    %c0_61 = arith.constant 0 : index
    %c0_62 = arith.constant 0 : index
    %156 = vector.load %arg10[%c0_61, %c0_62] : memref<8x128xf32, #tpu.memory_space<vmem>>, vector<8x128xf32>
    tpu.vector_store %arg10[%c0_61, %c0_62], %155 {strides = array<i32>} : memref<8x128xf32, #tpu.memory_space<vmem>>, vector<8x128xf32>,
    return
  }
  func.func @transform_0(%arg0: i32) -> (i32, i32, i32) {
    %c0_i32 = arith.constant 0 : i32
    %c0_i32_0 = arith.constant 0 : i32
    %c0_i32_1 = arith.constant 0 : i32
    return %arg0, %c0_i32, %c0_i32_0 : i32, i32, i32
  }
  func.func @transform_1(%arg0: i32) -> (i32, i32, i32) {
    %c0_i32 = arith.constant 0 : i32
    %c0_i32_0 = arith.constant 0 : i32
    %c0_i32_1 = arith.constant 0 : i32
    return %arg0, %c0_i32, %c0_i32_0 : i32, i32, i32
  }
  func.func @transform_2(%arg0: i32) -> (i32, i32, i32) {
    %c0_i32 = arith.constant 0 : i32
    %c0_i32_0 = arith.constant 0 : i32
    %c0_i32_1 = arith.constant 0 : i32
    return %arg0, %c0_i32, %c0_i32_0 : i32, i32, i32
  }
  func.func @transform_3(%arg0: i32) -> (i32, i32) {
    %c0_i32 = arith.constant 0 : i32
    %c0_i32_0 = arith.constant 0 : i32
    %c0_i32_1 = arith.constant 0 : i32
    return %c0_i32, %c0_i32_0 : i32, i32
  }
  func.func @transform_4(%arg0: i32) -> (i32, i32) {
    %c0_i32 = arith.constant 0 : i32
    %c0_i32_0 = arith.constant 0 : i32
    %c0_i32_1 = arith.constant 0 : i32
    return %c0_i32, %c0_i32_0 : i32, i32
  }
  func.func @transform_5(%arg0: i32) -> (i32, i32) {
    %c0_i32 = arith.constant 0 : i32
    %c0_i32_0 = arith.constant 0 : i32
    %c0_i32_1 = arith.constant 0 : i32
    return %c0_i32, %c0_i32_0 : i32, i32
  }
  func.func @transform_6(%arg0: i32) -> (i32, i32) {
    %c0_i32 = arith.constant 0 : i32
    %c0_i32_0 = arith.constant 0 : i32
    %c0_i32_1 = arith.constant 0 : i32
    return %c0_i32, %c0_i32_0 : i32, i32
  }
  func.func @transform_7(%arg0: i32) -> (i32, i32) {
    %c0_i32 = arith.constant 0 : i32
    %c0_i32_0 = arith.constant 0 : i32
    %c0_i32_1 = arith.constant 0 : i32
    return %c0_i32, %c0_i32_0 : i32, i32
  }
  func.func @transform_8(%arg0: i32) -> (i32, i32) {
    %c0_i32 = arith.constant 0 : i32
    %c0_i32_0 = arith.constant 0 : i32
    %c0_i32_1 = arith.constant 0 : i32
    return %c0_i32, %c0_i32_0 : i32, i32
  }
  func.func @transform_9(%arg0: i32) -> (i32, i32) {
    %c0_i32 = arith.constant 0 : i32
    %c0_i32_0 = arith.constant 0 : i32
    return %arg0, %c0_i32 : i32, i32
  }
}

</mosaic_0001>

<bundles_post_ra>
// kernel: tpu_custom_call.1
= control target key start
LH: loop header
LB: loop body
LE: loop exit
PB: predicated region body
PF: predicated region fallthrough
CT: control target
= control target key end

     0   :  { %s4817_s0 = inlined_call_operand.vmem [shape: f32[16,8,32], index: 0, kind: input, shape index: {}]   ;;  %s4818_s1 = inlined_call_operand.vmem [shape: f32[16,8,32], index: 1, kind: input, shape index: {}]   ;;  %s4819_s2 = inlined_call_operand.hbm [shape: f32[16,8,32], index: 2, kind: input, shape index: {}]   ;;  %s4820_s3 = inlined_call_operand.vmem [shape: f32[1,32], index: 3, kind: input, shape index: {}]   ;;  %s4821_s4 = inlined_call_operand.<no memory space> [shape: f32[1,1], index: 4, kind: input, shape index: {}]   ;;  %s4822_s5 = inlined_call_operand.vmem [shape: f32[192,32], index: 5, kind: input, shape index: {}]   ;;  %s4823_s6 = inlined_call_operand.vmem [shape: f32[1,32], index: 6, kind: input, shape index: {}]   ;;  %s4824_s7 = inlined_call_operand.hbm [shape: f32[32,128], index: 7, kind: input, shape index: {}]   ;;  %s4825_s8 = inlined_call_operand.vmem [shape: f32[1,128], index: 8, kind: input, shape index: {}]   ;;  %s4826_s9 = inlined_call_operand.hbm [shape: f32[16,128], index: 9, kind: output, shape index: {}]  }
   0x1   :  { %v14_v0 = vstv %s4821_s4 }
   0x2   :  { %15 = vst [vmem:[#allocation2] sm:$0x1] %v14_v0 }
   0x3   :  { %16 = vsyncpa [#allocation4], 0 }
   0x4   :  { %18 = vsyncpa [#allocation4 + $0x1], 0 }
   0x5   :  { %19 = vsyncpa [#allocation7], 0 }
   0x6   :  { %20 = vsyncpa [#allocation5], 0 }
   0x7   :  { %22 = vsyncpa [#allocation5 + $0x1], 0  ;;  %s3431_s11 = smov 0   ;;  %s3433_s12 = smov 0  }
   0x8   :  { %s3435_s13 = smov 0   ;;  %s3437_s14 = smov 0  }
   0x9 LB: > { %s3452_s4 = sadd.s32 4294967295, %s3367_s14   ;;  %s2866_s15 = sadd.s32 4294967294, %s3367_s14   ;;  %s3367_s14 = sphi %s3437_s14, %s4851_s14   ;;  %s3363_s13 = sphi %s3435_s13, %s4854_s13   ;;  %s3359_s12 = sphi %s3433_s12, %s4853_s12   ;;  %s3355_s11 = sphi %s3431_s11, %s4852_s11  }
   0xa   : > { %p100_p0 = scmp.ne.s32.totalorder %s3359_s12, %s3355_s11  ;;  %p4827_p1 = scmp.eq.s32.totalorder %s3452_s4, 0 }
   0xb   : > { %p256_p3 = scmp.eq.s32.totalorder %s2866_s15, 1  ;;  %p2867_p5 = scmp.ge.s32.totalorder %s3367_s14, 1 }
   0xc   : > { %p3461_p4 = por %p4827_p1, %p100_p0  ;;  %p263_p7 = scmp.lt.s32.totalorder %s3367_s14, 3 }
   0xd   : > { %p3466_p6 = por %p256_p3, %p100_p0  ;;  %s3369_s19 = smov [#allocation6]  }
   0xe   : > { %s4833_s16 = scalar_select %p3461_p4, 1, 0 }
   0xf   : > { %s4834_s17 = scalar_select %p3466_p6, 1, 0 }
  0x10   : > { %p3471_p8 = pnand %p2867_p5, %p263_p7  ;;  %s287_s20 = sshll.u32 %s3369_s19, 4  ;;  %s3475_s20 = int_to_ptr.vmem [resolvable:$true] %s287_s20 }
  0x11   : > { %s3487_s22 = sadd.s32 1, %s3367_s14   ;;  %s87_s23 = sadd.s32 1, %s3363_s13 }
  0x12   : > { %s4835_s18 = scalar_select %p3471_p8, 1, 0 }
  0x13   : > { %p3094_p9 = pneg %p3471_p8  ;;  %4837 = sst [smem:[#allocation12_spill]] %s3487_s22 }
  0x14   : > { %s84_s24 = ssub.s32 %s3367_s14, %s3487_s22  ;;  %s3239_s27 = scalar_lea.hbm %s4824_s7, 512 }
  0x15   : > { %p3482_p11 = pnand %p3094_p9, %p4827_p1  ;;  %p3240_p12 = scmp.ne.s32.totalorder %s4824_s7, %s3239_s27 }
  0x16   : > { %p3246_p5 = scmp.lt.u32.totalorder %s3239_s27, %s4824_s7 }
  0x17   : > { %p3241_p13 = pneg %p3482_p11 }
  0x19   : > { %p3242_p0 = pnand %p3241_p13, %p3240_p12 }
  0x1b   : > { %p3243_p3 = pneg %p3242_p0 }
  0x1d   : > { %p3248_p7 = pnand %p3246_p5, %p3243_p3 }
  0x1f   : > { %3251 = shalt.err (!%p3248_p7)
}
  0x20   : > { %s3252_s15 = scalar_lea.vmem %s3475_s20, 512  ;;  %p3260_p2 = scmp.lt.s32.totalorder %s3475_s20, %s3475_s20 }
  0x21   : > { %p3253_p9 = scmp.ne.s32.totalorder %s3475_s20, %s3252_s15  ;;  %p3261_p6 = scmp.lt.s32.totalorder %s3252_s15, %s3252_s15 }
  0x23   : > { %p3255_p10 = pnand %p3253_p9, %p3241_p13  ;;  %p3262_p4 = por %p3261_p6, %p3260_p2 }
  0x25   : > { %p3256_p1 = pneg %p3255_p10 }
  0x27   : > { %p3263_p8 = pnand %p3262_p4, %p3256_p1 }
  0x29   : > { %3266 = shalt.err (!%p3263_p8)
}
  0x2a   : > { %s4832_s19 = smov 128   ;;  %s3371_s25 = smov 8  }
  0x2b   : > { %3097 = dma.hbm_to_vmem [thread:$0]  (!%p3482_p11), %s4824_s7, 512, %s3475_s20, [#allocation7], %s4832_s19, %s4832_s19, %s3371_s25  }
  0x2c   : > { %p85_p1 = scmp.eq.s32.totalorder %s84_s24, 0  ;;  %p94_p2 = scmp.ne.s32.totalorder %s3363_s13, %s3359_s12 }
  0x2d   : > { %p95_p4 = scmp.eq.s32.totalorder %s3367_s14, 0  ;;  %p3107_p6 = scmp.lt.s32.totalorder %s3367_s14, 2 }
  0x2e   : > { %s3521_s28 = scalar_select %p85_p1, %s3363_s13, %s87_s23  }
  0x2f   : > { %p96_p8 = por %p95_p4, %p94_p2  ;;  %p4838_p10 = scmp.eq.s32.totalorder %s3452_s4, 1 }
  0x30   : > { %s322_s21 = sand.u32 1, %s3363_s13   ;;  %s2919_s30 = sshll.u32 %s3367_s14, 10 }
  0x31   : > { %p3525_p12 = por %p4838_p10, %p94_p2  ;;  %s2870_s10 = sshll.u32 %s322_s21, 6 }
  0x32   : > { %s3534_s26 = scalar_lea.hbm %s4819_s2, %s2919_s30  ;;  %s326_s20 = scalar_lea.vmem [#allocation3], %s2870_s10 }
  0x33   : > { %s333_s23 = sshll.u32 %s326_s20, 4  ;;  %p3536_p11 = pnand %p3107_p6, %p96_p8  ;;  %s3540_s23 = int_to_ptr.vmem [resolvable:$true] %s333_s23 }
  0x34   : > { %s3542_s27 = scalar_lea.sflag [#allocation4], %s322_s21  ;;  %s3267_s19 = scalar_lea.hbm %s3534_s26, 1024 }
  0x35   : > { %p3268_p13 = scmp.ne.s32.totalorder %s3534_s26, %s3267_s19  ;;  %p3269_p0 = pneg %p3536_p11 }
  0x36   : > { %s3272_s10 = scalar_lea.hbm %s4819_s2, 2048  ;;  %p3273_p7 = scmp.lt.u32.totalorder %s3534_s26, %s4819_s2 }
  0x37   : > { %p3270_p3 = pnand %p3269_p0, %p3268_p13  ;;  %p3274_p9 = scmp.lt.u32.totalorder %s3272_s10, %s3267_s19 }
  0x38   : > { %p3276_p2 = scmp.lt.u32.totalorder %s3267_s19, %s3534_s26 }
  0x39   : > { %p3271_p5 = pneg %p3270_p3  ;;  %p3275_p1 = por %p3274_p9, %p3273_p7 }
  0x3b   : > { %p3277_p4 = por %p3276_p2, %p3275_p1 }
  0x3d   : > { %p3278_p6 = pnand %p3277_p4, %p3271_p5 }
  0x3f   : > { %3281 = shalt.err (!%p3278_p6)
}
  0x40   : > { %s3282_s21 = scalar_lea.vmem %s3540_s23, 1024  ;;  %s3372_s22 = smov [#allocation3]  }
  0x41   : > { %p3283_p8 = scmp.ne.s32.totalorder %s3540_s23, %s3282_s21  ;;  %s3287_s30 = sshll.u32 %s3372_s22, 4  ;;  %s3288_s30 = int_to_ptr.vmem [resolvable:$false] %s3287_s30 }
  0x42   : > { %s3289_s15 = scalar_lea.vmem %s3288_s30, 2048  ;;  %p3290_p3 = scmp.lt.s32.totalorder %s3540_s23, %s3288_s30 }
  0x43   : > { %p3285_p10 = pnand %p3283_p8, %p3269_p0  ;;  %p3291_p7 = scmp.lt.s32.totalorder %s3289_s15, %s3282_s21 }
  0x45   : > { %p3286_p13 = pneg %p3285_p10  ;;  %p3292_p9 = por %p3291_p7, %p3290_p3 }
  0x47   : > { %p3293_p1 = pnand %p3292_p9, %p3286_p13 }
  0x49   : > { %3296 = shalt.err (!%p3293_p1)
}
  0x4a   : > { %s4841_s19 = smov 128   ;;  %p4842_p0 = scmp.ne.s32.totalorder %s4835_s18, 0 }
  0x4b   : > { %3101 = dma.hbm_to_vmem [thread:$0]  (!%p3536_p11), %s3534_s26, 1024, %s3540_s23, %s3542_s27, %s4841_s19, %s4841_s19, %s3371_s25  }
  0x4c   : > { %345 = sbr.rel (%p4842_p0) target bundleno = 1661 (0x67d), region = 56  ;;  %s3576_s10 = sand.u32 (!%p4842_p0), 1, %s3359_s12  }
  0x4d   : > { %s2874_s20 = sshll.u32 (!%p4842_p0), %s3576_s10, 6  ;;  %s348_s21 = scalar_lea.sflag (!%p4842_p0), [#allocation4], %s3576_s10 }
  0x4e   : > { %s3580_s22 = scalar_lea.vmem (!%p4842_p0), [#allocation3], %s2874_s20  ;;  %p4843_p5 = scmp.ne.s32.totalorder (!%p4842_p0), %s4833_s16, 0 }
  0x53   : > { %3342 = dma.done.wait (%p4843_p5), %s348_s21, 1024  }
  0x54   : > { %3344 = vsyncadd (%p4843_p5), %s348_s21, 4294966272  ;;  %p4844_p11 = scmp.eq.s32.totalorder %s3452_s4, 0 }
  0x56   : > { %3346 = dma.done.wait (%p4844_p11), [#allocation7], 512   ;;  %p4845_p2 = pmov %p4844_p11 }
  0x57   : > { %s2877_s18 = sshll.u32 %s3452_s4, 3  ;;  %vm438_vm0 = vcmask 261120   ;;  %v1486_v1 = vld [vmem:[%s3580_s22] sm:$0xff]  ;;  %v1487_v3 = vld [vmem:[%s3580_s22 + $0x8] sm:$0xff]  ;;  %v3606_v8 = vld [vmem:[%s3580_s22 + $0x10] sm:$0xff]  ;;  %vm594_vm12 = vcmask 1041409  }
  0x58   : > { %3348 = vsyncadd (%p4845_p2), [#allocation7], 4294966784  ;;  %p401_p4 = scmp.lt.s32.totalorder %s2877_s18, 15  ;;  %v1534_v4 = vand.u32 2147483647, %v1486_v1  ;;  %v3615_v17 = vld [vmem:[%s3580_s22 + $0x18] sm:$0xff] }
  0x59   : > { %v1535_v6 = vand.u32 2147483647, %v1487_v3  ;;  %v1536_v15 = vand.u32 2147483647, %v3606_v8  ;;  %v1537_v21 = vand.u32 2147483647, %v3615_v17 }
  0x5a   : > { %s4856_s18 = smov (!%p401_p4, %s2877_s18), 15  ;;  %v1542_v10 = vsel %vm438_vm0, %v1534_v4, -inf  ;;  %v3622_v23 = vld [vmem:[%s3580_s22 + $0x20] sm:$0xff]  ;;  %v3634_v29 = vld [vmem:[%s4820_s3] ss:$0 sm:$0xff]  ;;  %v1491_v40 = vld [vmem:[%s3580_s22 + $0x28] sm:$0xff] }
  0x5b   : > { %s2878_s25 = sshll.u32 %s4856_s18, 3  ;;  %1543 = vmax.xlane.f32.xlu1 %v1542_v10  ;;  %v1545_v13 = vsel %vm438_vm0, %v1535_v6, -inf  ;;  %v1548_v19 = vsel %vm438_vm0, %v1536_v15, -inf  ;;  %v1551_v25 = vsel %vm438_vm0, %v1537_v21, -inf  ;;  %v1538_v27 = vand.u32 2147483647, %v3622_v23 }
  0x5c   : > { %s3599_s23 = scalar_lea.vmem %s4817_s0, %s2878_s25  ;;  %v414_v30 = vld [vmem:[#allocation2] sm:$0x1]  ;;  %v1494_v38 = vmul.f32 %v3634_v29, %v1486_v1  ;;  %v1539_v43 = vand.u32 2147483647, %v1491_v40  ;;  %v1495_v44 = vmul.f32 %v3634_v29, %v1487_v3  ;;  %v1492_v50 = vld [vmem:[%s3580_s22 + $0x30] sm:$0xff]  ;;  %v1496_v54 = vmul.f32 %v3634_v29, %v3606_v8  ;;  %s3671_s19 = scalar_lea.vmem %s4818_s1, %s2878_s25 }
  0x5d   : > { %v416_v2 = vld [vmem:[%s3599_s23] sm:$0xff]  ;;  %v417_v7 = vld [vmem:[%s3599_s23 + $0x8] sm:$0xff]  ;;  %v418_v9 = vld [vmem:[%s3599_s23 + $0x10] sm:$0xff]  ;;  %3084 = vpush %v414_v30  ;;  %v1554_v31 = vsel %vm438_vm0, %v1538_v27, -inf  ;;  %v1540_v53 = vand.u32 2147483647, %v1492_v50  ;;  %v1497_v0 = vmul.f32 %v3634_v29, %v3615_v17  ;;  %v1498_v3 = vmul.f32 %v3634_v29, %v3622_v23 }
  0x5e   : > { %v472_v5 = vand.u32 2147483647, %v416_v2  ;;  %v473_v12 = vand.u32 2147483647, %v417_v7  ;;  %v474_v16 = vand.u32 2147483647, %v418_v9  ;;  %v431_v33 = vmul.f32 %v3634_v29, %v417_v7 }
  0x5f   : > { %v419_v18 = vld [vmem:[%s3599_s23 + $0x18] sm:$0xff]  ;;  %1546 = vmax.xlane.f32.xlu1 %v1545_v13  ;;  %v3625_v24 = vld [vmem:[%s3599_s23 + $0x20] sm:$0xff]  ;;  %v430_v34 = vmul.f32 %v3634_v29, %v416_v2  ;;  %v421_v35 = vld [vmem:[%s3599_s23 + $0x28] sm:$0xff]  ;;  %v1502_v41 = vsel %vm438_vm0, %v1494_v38, 0.0  ;;  %v1557_v46 = vsel %vm438_vm0, %v1539_v43, -inf  ;;  %v1505_v47 = vsel %vm438_vm0, %v1495_v44, 0.0 }
  0x60   : > { %v480_v11 = vsel %vm438_vm0, %v472_v5, -inf  ;;  %v483_v14 = vsel %vm438_vm0, %v473_v12, -inf  ;;  %v486_v20 = vsel %vm438_vm0, %v474_v16, -inf  ;;  %v475_v22 = vand.u32 2147483647, %v419_v18  ;;  %v422_v45 = vld [vmem:[%s3599_s23 + $0x30] sm:$0xff] }
  0x61   : > { %481 = vmax.xlane.f32.xlu0 %v480_v11  ;;  %v476_v28 = vand.u32 2147483647, %v3625_v24  ;;  %v442_v36 = vsel %vm438_vm0, %v431_v33, 0.0  ;;  %v439_v37 = vsel %vm438_vm0, %v430_v34, 0.0  ;;  %v477_v39 = vand.u32 2147483647, %v421_v35 }
  0x62   : > { %v489_v26 = vsel %vm438_vm0, %v475_v22, -inf  ;;  %v478_v48 = vand.u32 2147483647, %v422_v45  ;;  %v432_v49 = vmul.f32 %v3634_v29, %v418_v9  ;;  %v423_v55 = vld [vmem:[%s3599_s23 + $0x38] sm:$0xff]  ;;  %v1560_v56 = vsel %vm438_vm0, %v1540_v53, -inf  ;;  %v960_v5 = vld [vmem:[%s3671_s19] sm:$0xff] }
  0x63   : > { %1549 = vmax.xlane.f32.xlu1 %v1548_v19  ;;  %v492_v32 = vsel %vm438_vm0, %v476_v28, -inf  ;;  %v495_v42 = vsel %vm438_vm0, %v477_v39, -inf  ;;  %v1508_v57 = vsel %vm438_vm0, %v1496_v54, 0.0  ;;  %v479_v58 = vand.u32 2147483647, %v423_v55  ;;  %v1493_v60 = vld [vmem:[%s3580_s22 + $0x38] sm:$0xff] }
  0x64   : > { %v498_v51 = vsel %vm438_vm0, %v478_v48, -inf  ;;  %v445_v52 = vsel %vm438_vm0, %v432_v49, 0.0  ;;  %v433_v59 = vmul.f32 %v3634_v29, %v419_v18  ;;  %v1541_v63 = vand.u32 2147483647, %v1493_v60  ;;  %v961_v10 = vld [vmem:[%s3671_s19 + $0x8] sm:$0xff]  ;;  %v962_v15 = vld [vmem:[%s3671_s19 + $0x10] sm:$0xff] }
  0x65   : > { %484 = vmax.xlane.f32.xlu0 %v483_v14  ;;  %v501_v61 = vsel %vm438_vm0, %v479_v58, -inf  ;;  %v1511_v2 = vsel %vm438_vm0, %v1497_v0, 0.0  ;;  %v434_v4 = vmul.f32 %v3634_v29, %v3625_v24  ;;  %v1514_v6 = vsel %vm438_vm0, %v1498_v3, 0.0  ;;  %v963_v24 = vld [vmem:[%s3671_s19 + $0x18] sm:$0xff]  ;;  %v964_v30 = vld [vmem:[%s3671_s19 + $0x20] sm:$0xff]  ;;  %s2876_s21 = sshll.u32 %s3576_s10, 3 }
  0x66   : > { %v448_v62 = vsel %vm438_vm0, %v433_v59, 0.0  ;;  %v1563_v1 = vsel %vm438_vm0, %v1541_v63, -inf  ;;  %v1008_v8 = vand.u32 2147483647, %v960_v5  ;;  %v435_v9 = vmul.f32 %v3634_v29, %v421_v35  ;;  %v965_v35 = vld [vmem:[%s3671_s19 + $0x28] sm:$0xff]  ;;  %s399_s18 = scalar_lea.vmem [#allocation8], %s2876_s21 }
  0x67   : > { %1552 = vmax.xlane.f32.xlu1 %v1551_v25  ;;  %v451_v7 = vsel %vm438_vm0, %v434_v4, 0.0  ;;  %v1499_v13 = vmul.f32 %v3634_v29, %v1491_v40  ;;  %v1009_v14 = vand.u32 2147483647, %v961_v10  ;;  %v1010_v18 = vand.u32 2147483647, %v962_v15  ;;  %v966_v40 = vld [vmem:[%s3671_s19 + $0x30] sm:$0xff] }
  0x68   : > { %v1016_v11 = vsel %vm438_vm0, %v1008_v8, -inf  ;;  %v454_v12 = vsel %vm438_vm0, %v435_v9, 0.0  ;;  %v436_v19 = vmul.f32 %v3634_v29, %v422_v45  ;;  %v437_v22 = vmul.f32 %v3634_v29, %v423_v55  ;;  %v967_v45 = vld [vmem:[%s3671_s19 + $0x38] sm:$0xff]  ;;  %s2762_s25 = sshll.u32 %s399_s18, 4  ;;  %s2749_s24 = scalar_lea.sflag [#allocation5], %s3576_s10  ;;  %s4775_s25 = int_to_ptr.vmem [resolvable:$true] %s2762_s25 }
  0x69   : > { %487 = vmax.xlane.f32.xlu0 %v486_v20  ;;  %v1517_v16 = vsel %vm438_vm0, %v1499_v13, 0.0  ;;  %v1019_v17 = vsel %vm438_vm0, %v1009_v14, -inf  ;;  %v1022_v20 = vsel %vm438_vm0, %v1010_v18, -inf  ;;  %v1500_v23 = vmul.f32 %v3634_v29, %v1492_v50  ;;  %s3297_s27 = scalar_lea.vmem %s4775_s25, 128 }
  0x6a   : > { %v457_v21 = vsel %vm438_vm0, %v436_v19, 0.0  ;;  %v460_v25 = vsel %vm438_vm0, %v437_v22, 0.0  ;;  %v1501_v27 = vmul.f32 %v3634_v29, %v1493_v60  ;;  %v1011_v28 = vand.u32 2147483647, %v963_v24  ;;  %p3298_p6 = scmp.ne.s32.totalorder %s4775_s25, %s3297_s27 }
  0x6b   : > { %1555 = vmax.xlane.f32.xlu1 %v1554_v31  ;;  %v968_v33 = vmul.f32 %v3634_v29, %v960_v5  ;;  %v1012_v34 = vand.u32 2147483647, %v964_v30  ;;  %v1013_v38 = vand.u32 2147483647, %v965_v35  ;;  %v969_v39 = vmul.f32 %v3634_v29, %v961_v10 }
  0x6c   : > { %v1523_v31 = vsel %vm438_vm0, %v1501_v27, 0.0  ;;  %v1014_v43 = vand.u32 2147483647, %v966_v40  ;;  %v970_v44 = vmul.f32 %v3634_v29, %v962_v15  ;;  %v1015_v48 = vand.u32 2147483647, %v967_v45  ;;  %p3299_p8 = pnand %p3298_p6, %p3525_p12 }
  0x6d   : > { %490 = vmax.xlane.f32.xlu0 %v489_v26  ;;  %v1520_v26 = vsel %vm438_vm0, %v1500_v23, 0.0  ;;  %v971_v49 = vmul.f32 %v3634_v29, %v963_v24  ;;  %v972_v53 = vmul.f32 %v3634_v29, %v964_v30  ;;  %v3373_v15 = vmov 0.0  }
  0x6e   : > { %v1037_v50 = vsel %vm438_vm0, %v1015_v48, -inf  ;;  %p3300_p10 = pneg %p3299_p8 }
  0x6f   : > { %443 = vadd.xlane.f32.xlu1 %v442_v36  ;;  %v976_v36 = vsel %vm438_vm0, %v968_v33, 0.0  ;;  %v988_v55 = vsel %vm438_vm0, %v972_v53, 0.0 }
  0x71   : > { %493 = vmax.xlane.f32.xlu0 %v492_v32  ;;  %v1025_v32 = vsel %vm438_vm0, %v1011_v28, -inf }
  0x73   : > { %1503 = vadd.xlane.f32.xlu1 %v1502_v41  ;;  %v1031_v41 = vsel %vm438_vm0, %v1013_v38, -inf }
  0x75   : > { %440 = vadd.xlane.f32.xlu0 %v439_v37  ;;  %v1028_v37 = vsel %vm438_vm0, %v1012_v34, -inf }
  0x77   : > { %1558 = vmax.xlane.f32.xlu1 %v1557_v46  ;;  %v1034_v46 = vsel %vm438_vm0, %v1014_v43, -inf }
  0x79   : > { %496 = vmax.xlane.f32.xlu0 %v495_v42  ;;  %v979_v42 = vsel %vm438_vm0, %v969_v39, 0.0 }
  0x7b   : > { %499 = vmax.xlane.f32.xlu1 %v498_v51  ;;  %v985_v51 = vsel %vm438_vm0, %v971_v49, 0.0 }
  0x7d   : > { %1506 = vadd.xlane.f32.xlu0 %v1505_v47  ;;  %v982_v47 = vsel %vm438_vm0, %v970_v44, 0.0 }
  0x7f   : > { %1561 = vmax.xlane.f32.xlu1 %v1560_v56  ;;  %v975_v56 = vmul.f32 %v3634_v29, %v967_v45 }
  0x81   : > { %446 = vadd.xlane.f32.xlu0 %v445_v52  ;;  %v973_v52 = vmul.f32 %v3634_v29, %v965_v35  ;;  %v997_v58 = vsel %vm438_vm0, %v975_v56, 0.0 }
  0x83   : > { %502 = vmax.xlane.f32.xlu1 %v501_v61  ;;  %v991_v54 = vsel %vm438_vm0, %v973_v52, 0.0 }
  0x85   : > { %1509 = vadd.xlane.f32.xlu0 %v1508_v57  ;;  %v974_v57 = vmul.f32 %v3634_v29, %v966_v40 }
  0x87   : > { %1564 = vmax.xlane.f32.xlu1 %v1563_v1  ;;  %v994_v59 = vsel %vm438_vm0, %v974_v57, 0.0 }
  0x89   : > { %449 = vadd.xlane.f32.xlu0 %v448_v62 }
  0x8b   : > { %1515 = vadd.xlane.f32.xlu1 %v1514_v6 }
  0x8d   : > { %1512 = vadd.xlane.f32.xlu0 %v1511_v2 }
  0x8e   : > { %s3085_s20 = spop %3084 }
  0x8f   : > { %1017 = vmax.xlane.f32.xlu1 %v1016_v11  ;;  %v3747_v22 = vstv %s3085_s20 }
  0x91   : > { %452 = vadd.xlane.f32.xlu0 %v451_v7 }
  0x93   : > { %1518 = vadd.xlane.f32.xlu1 %v1517_v16 }
  0x95   : > { %455 = vadd.xlane.f32.xlu0 %v454_v12 }
  0x97   : > { %1023 = vmax.xlane.f32.xlu1 %v1022_v20 }
  0x99   : > { %1020 = vmax.xlane.f32.xlu0 %v1019_v17  ;;  %v560_v17 = vlaneseq }
  0x9b   : > { %461 = vadd.xlane.f32.xlu1 %v460_v25  ;;  %v561_v25 = vand.u32 127, %v560_v17  ;;  %v3752_v28 = vshrl.u32 %v560_v17, 7 }
  0x9d   : > { %458 = vadd.xlane.f32.xlu0 %v457_v21  ;;  %v3764_v44 = vsub.s32 %v561_v25, %v3752_v28 }
  0x9f   : > { %1524 = vadd.xlane.f32.xlu1 %v1523_v31 }
  0xa1   : > { %1521 = vadd.xlane.f32.xlu0 %v1520_v26 }
  0xa3   : > { %977 = vadd.xlane.f32.xlu1 %v976_v36 }
  0xa5   : > { %1026 = vmax.xlane.f32.xlu0 %v1025_v32 }
  0xa7   : > { %1032 = vmax.xlane.f32.xlu1 %v1031_v41 }
  0xa9   : > { %1029 = vmax.xlane.f32.xlu0 %v1028_v37 }
  0xab   : > { %1035 = vmax.xlane.f32.xlu1 %v1034_v46 }
  0xad   : > { %980 = vadd.xlane.f32.xlu0 %v979_v42 }
  0xaf   : > { %1038 = vmax.xlane.f32.xlu1 %v1037_v50 }
  0xb1   : > { %983 = vadd.xlane.f32.xlu0 %v982_v47 }
  0xb3   : > { %992 = vadd.xlane.f32.xlu1 %v991_v54 }
  0xb5   : > { %986 = vadd.xlane.f32.xlu0 %v985_v51 }
  0xb7   : > { %998 = vadd.xlane.f32.xlu1 %v997_v58 }
  0xb9   : > { %989 = vadd.xlane.f32.xlu0 %v988_v55 }
  0xbd   : > { %995 = vadd.xlane.f32.xlu0 %v994_v59 }
  0xe8   : > { %v1544_v60 = vpop.xlane.xlu1 %1543 }
  0xe9   : > { %vm1566_vm3 = vcmp.gt.f32.partialorder %v1544_v60, 0.0 }
  0xea   : > { %v2898_v23 = vsel %vm1566_vm3, 1.0, %v3373_v15  ;;  %vm598_vm3 = vcmask 1043459  }
  0xeb   : > { %v1590_v36 = vsub.f32 1.0, %v2898_v23 }
  0xec   : > { %v1547_v62 = vpop.xlane.xlu1 %1546 }
  0xed   : > { %vm1567_vm4 = vcmp.gt.f32.partialorder %v1547_v62, 0.0  ;;  %v1598_v51 = vmul.f32 1000000.0, %v1590_v36 }
  0xee   : > { %v482_v61 = vpop.xlane.xlu0 %481  ;;  %v2899_v26 = vsel %vm1567_vm4, 1.0, %v3373_v15  ;;  %vm600_vm4 = vcmask 1044484  }
  0xef   : > { %vm504_vm1 = vcmp.gt.f32.partialorder %v482_v61, 0.0  ;;  %v1591_v38 = vsub.f32 1.0, %v2899_v26 }
  0xf0   : > { %v1550_v0 = vpop.xlane.xlu1 %1549  ;;  %v2882_v16 = vsel %vm504_vm1, 1.0, %v3373_v15 }
  0xf1   : > { %vm1568_vm5 = vcmp.gt.f32.partialorder %v1550_v0, 0.0  ;;  %v528_v21 = vsub.f32 1.0, %v2882_v16  ;;  %v1599_v53 = vmul.f32 1000000.0, %v1591_v38 }
  0xf2   : > { %v485_v63 = vpop.xlane.xlu0 %484  ;;  %v2900_v27 = vsel %vm1568_vm5, 1.0, %v3373_v15 }
  0xf3   : > { %vm505_vm2 = vcmp.gt.f32.partialorder %v485_v63, 0.0  ;;  %v536_v37 = vmul.f32 1000000.0, %v528_v21  ;;  %v1592_v40 = vsub.f32 1.0, %v2900_v27 }
  0xf4   : > { %v1553_v2 = vpop.xlane.xlu1 %1552  ;;  %v2883_v18 = vsel %vm505_vm2, 1.0, %v3373_v15  ;;  %vm596_vm2 = vcmask 1042434  }
  0xf5   : > { %vm1569_vm7 = vcmp.gt.f32.partialorder %v1553_v2, 0.0  ;;  %v529_v24 = vsub.f32 1.0, %v2883_v18  ;;  %v3773_v54 = vmul.f32 1000000.0, %v1592_v40 }
  0xf6   : > { %v488_v1 = vpop.xlane.xlu0 %487  ;;  %v2901_v31 = vsel %vm1569_vm7, 1.0, %v3373_v15  ;;  %vm604_vm7 = vcmask 1046534  }
  0xf7   : > { %vm506_vm6 = vcmp.gt.f32.partialorder %v488_v1, 0.0  ;;  %v537_v39 = vmul.f32 1000000.0, %v529_v24  ;;  %v1593_v43 = vsub.f32 1.0, %v2901_v31 }
  0xf8   : > { %v1556_v4 = vpop.xlane.xlu1 %1555  ;;  %v2884_v30 = vsel %vm506_vm6, 1.0, %v3373_v15  ;;  %vm602_vm6 = vcmask 1045509  }
  0xf9   : > { %vm1570_vm9 = vcmp.gt.f32.partialorder %v1556_v4, 0.0  ;;  %v530_v42 = vsub.f32 1.0, %v2884_v30  ;;  %v1601_v58 = vmul.f32 1000000.0, %v1593_v43 }
  0xfa   : > { %v491_v3 = vpop.xlane.xlu0 %490  ;;  %v2902_v45 = vsel %vm1570_vm9, 1.0, %v3373_v15  ;;  %vm609_vm9 = vcmask 64512  }
  0xfb   : > { %vm507_vm8 = vcmp.gt.f32.partialorder %v491_v3, 0.0  ;;  %v538_v55 = vmul.f32 1000000.0, %v530_v42  ;;  %v1594_v56 = vsub.f32 1.0, %v2902_v45 }
  0xfc   : > { %v444_v6 = vpop.xlane.xlu1 %443  ;;  %v2885_v41 = vsel %vm507_vm8, 1.0, %v3373_v15  ;;  %vm606_vm8 = vcmask 1047559  }
  0xfd   : > { %v465_v32 = vadd.f32 %v3747_v22, %v444_v6  ;;  %v531_v52 = vsub.f32 1.0, %v2885_v41  ;;  %v1602_v6 = vmul.f32 1000000.0, %v1594_v56 }
  0xfe   : > { %v494_v5 = vpop.xlane.xlu0 %493 }
  0xff   : > { %vm508_vm10 = vcmp.gt.f32.partialorder %v494_v5, 0.0  ;;  %v3768_v47 = vsub.f32 %v465_v32, %v537_v39  ;;  %v539_v0 = vmul.f32 1000000.0, %v531_v52 }
 0x100   : > { %v3725_v7 = vpop.xlane.xlu1 %1503  ;;  %v2886_v46 = vsel %vm508_vm10, 1.0, %v3373_v15 }
 0x101   : > { %v532_v57 = vsub.f32 1.0, %v2886_v46  ;;  %v569_v59 = vrot.slane %v3768_v47, %v3764_v44  ;;  %v1526_v1 = vadd.f32 %v3725_v7, %v3747_v22 }
 0x102   : > { %v441_v29 = vpop.xlane.xlu0 %440 }
 0x103   : > { %v464_v33 = vadd.f32 %v3747_v22, %v441_v29  ;;  %v540_v29 = vmul.f32 1000000.0, %v532_v57 }
 0x104   : > { %v3729_v9 = vpop.xlane.xlu1 %1558 }
 0x105   : > { %v3770_v48 = vsub.f32 %v464_v33, %v536_v37  ;;  %vm1571_vm14 = vcmp.gt.f32.partialorder %v3729_v9, 0.0 }
 0x106   : > { %v3727_v8 = vpop.xlane.xlu0 %496  ;;  %v2903_v3 = vsel %vm1571_vm14, 1.0, %v3373_v15 }
 0x107   : > { %vm509_vm11 = vcmp.gt.f32.partialorder %v3727_v8, 0.0  ;;  %v565_v60 = vrot.slane %v3770_v48, %v3764_v44  ;;  %v1595_v18 = vsub.f32 1.0, %v2903_v3 }
 0x108   : > { %v3733_v11 = vpop.xlane.xlu1 %499  ;;  %v2887_v61 = vsel %vm509_vm11, 1.0, %v3373_v15 }
 0x109   : > { %vm510_vm13 = vcmp.gt.f32.partialorder %v3733_v11, 0.0  ;;  %v533_v8 = vsub.f32 1.0, %v2887_v61  ;;  %v595_v9 = vsel %vm594_vm12, %v569_v59, %v565_v60 }
 0x10a   : > { %v3731_v10 = vpop.xlane.xlu0 %1506  ;;  %v2888_v2 = vsel %vm510_vm13, 1.0, %v3373_v15 }
 0x10b   : > { %v1527_v4 = vadd.f32 %v3731_v10, %v3747_v22  ;;  %v534_v11 = vsub.f32 1.0, %v2888_v2  ;;  %v541_v25 = vmul.f32 1000000.0, %v533_v8 }
 0x10c   : > { %v3737_v13 = vpop.xlane.xlu1 %1561 }
 0x10d   : > { %vm1572_vm15 = vcmp.gt.f32.partialorder %v3737_v13, 0.0  ;;  %v542_v31 = vmul.f32 1000000.0, %v534_v11 }
 0x10e   : > { %v3735_v12 = vpop.xlane.xlu0 %446  ;;  %v2904_v13 = vsel %vm1572_vm15, 1.0, %v3373_v15 }
 0x10f   : > { %v466_v5 = vadd.f32 %v3747_v22, %v3735_v12  ;;  %v3801_v12 = vsub.f32 %v1526_v1, %v1598_v51  ;;  %v1596_v26 = vsub.f32 1.0, %v2904_v13 }
 0x110   : > { %v3743_v19 = vpop.xlane.xlu1 %502 }
 0x111   : > { %vm511_vm1 = vcmp.gt.f32.partialorder %v3743_v19, 0.0  ;;  %v3807_v23 = vsub.f32 %v466_v5, %v538_v55  ;;  %v1604_v45 = vmul.f32 1000000.0, %v1596_v26  ;;  %v1625_v61 = vrot.slane %v3801_v12, %v3764_v44 }
 0x112   : > { %v3739_v14 = vpop.xlane.xlu0 %1509  ;;  %v2889_v19 = vsel %vm511_vm1, 1.0, %v3373_v15 }
 0x113   : > { %v1528_v24 = vadd.f32 %v3739_v14, %v3747_v22  ;;  %v535_v32 = vsub.f32 1.0, %v2889_v19  ;;  %v573_v42 = vrot.slane %v3807_v23, %v3764_v44 }
 0x114   : > { %v3758_v34 = vpop.xlane.xlu1 %1564 }
 0x115   : > { %vm1573_vm5 = vcmp.gt.f32.partialorder %v3758_v34, 0.0  ;;  %v3831_v43 = vsub.f32 %v1528_v24, %v3773_v54  ;;  %v543_v51 = vmul.f32 1000000.0, %v535_v32 }
 0x116   : > { %v3745_v20 = vpop.xlane.xlu0 %449  ;;  %v2905_v34 = vsel %vm1573_vm5, 1.0, %v3373_v15 }
 0x117   : > { %v467_v7 = vadd.f32 %v3747_v22, %v3745_v20  ;;  %v3805_v20 = vsub.f32 %v1527_v4, %v1599_v53  ;;  %v1597_v52 = vsub.f32 1.0, %v2905_v34 }
 0x118   : > { %v1516_v49 = vpop.xlane.xlu1 %1515 }
 0x119   : > { %v3812_v27 = vsub.f32 %v467_v7, %v539_v0  ;;  %v1530_v33 = vadd.f32 %v1516_v49, %v3747_v22  ;;  %v1629_v41 = vrot.slane %v3805_v20, %v3764_v44  ;;  %v1633_v0 = vrot.slane %v3831_v43, %v3764_v44 }
 0x11a   : > { %v3760_v35 = vpop.xlane.xlu0 %1512 }
 0x11b   : > { %v1529_v30 = vadd.f32 %v3760_v35, %v3747_v22  ;;  %v1603_v35 = vmul.f32 1000000.0, %v1595_v18  ;;  %v577_v46 = vrot.slane %v3812_v27, %v3764_v44  ;;  %v3839_v53 = vsub.f32 %v1530_v33, %v1602_v6 }
 0x11c   : > { %v3782_v62 = vpop.xlane.xlu1 %1017  ;;  %v1654_v6 = vsel %vm594_vm12, %v1629_v41, %v1625_v61 }
 0x11d   : > { %v3835_v49 = vsub.f32 %v1529_v30, %v1601_v58  ;;  %v1641_v8 = vrot.slane %v3839_v53, %v3764_v44  ;;  %v1655_v19 = vsel %vm596_vm2, %v1633_v0, %v1654_v6  ;;  %vm1040_vm14 = vcmp.gt.f32.partialorder %v3782_v62, 0.0 }
 0x11e   : > { %v453_v50 = vpop.xlane.xlu0 %452 }
 0x11f   : > { %v468_v10 = vadd.f32 %v3747_v22, %v453_v50  ;;  %v1637_v3 = vrot.slane %v3835_v49, %v3764_v44 }
 0x120   : > { %v1519_v16 = vpop.xlane.xlu1 %1518 }
 0x121   : > { %v3817_v36 = vsub.f32 %v468_v10, %v540_v29  ;;  %v1531_v39 = vadd.f32 %v1519_v16, %v3747_v22  ;;  %v1605_v29 = vmul.f32 1000000.0, %v1597_v52 }
 0x122   : > { %v456_v63 = vpop.xlane.xlu0 %455 }
 0x123   : > { %v469_v21 = vadd.f32 %v3747_v22, %v456_v63  ;;  %v581_v55 = vrot.slane %v3817_v36, %v3764_v44  ;;  %v3845_v59 = vsub.f32 %v1531_v39, %v1603_v35  ;;  %v597_v63 = vsel %vm596_vm2, %v573_v42, %v595_v9 }
 0x124   : > { %v3819_v37 = vpop.xlane.xlu1 %1023  ;;  %v599_v2 = vsel %vm598_vm3, %v577_v46, %v597_v63 }
 0x125   : > { %v3822_v38 = vsub.f32 %v469_v21, %v541_v25  ;;  %v601_v11 = vsel %vm600_vm4, %v581_v55, %v599_v2  ;;  %v1645_v13 = vrot.slane %v3845_v59, %v3764_v44  ;;  %v1656_v25 = vsel %vm598_vm3, %v1637_v3, %v1655_v19 }
 0x126   : > { %v3799_v17 = vpop.xlane.xlu0 %1020  ;;  %vm1042_vm11 = vcmp.gt.f32.partialorder %v3819_v37, 0.0 }
 0x127   : > { %v585_v54 = vrot.slane %v3822_v38, %v3764_v44  ;;  %vm1041_vm10 = vcmp.gt.f32.partialorder %v3799_v17, 0.0  ;;  %v2892_v41 = vsel %vm1042_vm11, 1.0, %v3373_v15 }
 0x128   : > { %v462_v56 = vpop.xlane.xlu1 %461  ;;  %v2891_v17 = vsel %vm1041_vm10, 1.0, %v3373_v15  ;;  %v1066_v52 = vsub.f32 1.0, %v2892_v41 }
 0x129   : > { %v471_v60 = vadd.f32 %v3747_v22, %v462_v56  ;;  %v603_v18 = vsel %vm602_vm6, %v585_v54, %v601_v11  ;;  %v1065_v62 = vsub.f32 1.0, %v2891_v17 }
 0x12a   : > { %v459_v14 = vpop.xlane.xlu0 %458  ;;  %v1074_v3 = vmul.f32 1000000.0, %v1066_v52 }
 0x12b   : > { %v470_v40 = vadd.f32 %v3747_v22, %v459_v14  ;;  %v3859_v4 = vsub.f32 %v471_v60, %v543_v51  ;;  %v1657_v14 = vsel %vm600_vm4, %v1641_v8, %v1656_v25  ;;  %v2890_v51 = vsel %vm1040_vm14, 1.0, %v3373_v15 }
 0x12c   : > { %v1525_v7 = vpop.xlane.xlu1 %1524  ;;  %v1658_v39 = vsel %vm602_vm6, %v1645_v13, %v1657_v14  ;;  %v1073_v0 = vmul.f32 1000000.0, %v1065_v62 }
 0x12d   : > { %v3837_v50 = vsub.f32 %v470_v40, %v542_v31  ;;  %v593_v10 = vrot.slane %v3859_v4, %v3764_v44  ;;  %v1533_v16 = vadd.f32 %v1525_v7, %v3747_v22 }
 0x12e   : > { %v1522_v57 = vpop.xlane.xlu0 %1521 }
 0x12f   : > { %v1532_v58 = vadd.f32 %v1522_v57, %v3747_v22  ;;  %v589_v1 = vrot.slane %v3837_v50, %v3764_v44  ;;  %v3878_v26 = vsub.f32 %v1533_v16, %v1605_v29  ;;  %v1064_v57 = vsub.f32 1.0, %v2890_v51 }
 0x130   : > { %v978_v31 = vpop.xlane.xlu1 %977 }
 0x131   : > { %v3861_v5 = vsub.f32 %v1532_v58, %v1604_v45  ;;  %v605_v24 = vsel %vm604_vm7, %v589_v1, %v603_v18  ;;  %v1653_v34 = vrot.slane %v3878_v26, %v3764_v44  ;;  %v1000_v1 = vadd.f32 %v978_v31, %v3747_v22 }
 0x132   : > { %v1027_v9 = vpop.xlane.xlu0 %1026  ;;  %v607_v30 = vsel %vm606_vm8, %v593_v10, %v605_v24  ;;  %v1072_v8 = vmul.f32 1000000.0, %v1064_v57 }
 0x133   : > { %v1649_v21 = vrot.slane %v3861_v5, %v3764_v44  ;;  %v610_v33 = vsel %vm609_vm9, %v607_v30, -inf  ;;  %vm1043_vm13 = vcmp.gt.f32.partialorder %v1027_v9, 0.0 }
 0x134   : > { %611 = vmax.xlane.f32.xlu0 %v610_v33  ;;  %v2893_v42 = vsel %vm1043_vm13, 1.0, %v3373_v15  ;;  %v1033_v37 = vpop.xlane.xlu1 %1032  ;;  %v3907_v18 = vsub.f32 %v1000_v1, %v1072_v8  ;;  %v3949_v8 = vsub.s32 0, %v3752_v28 }
 0x135   : > { %v1659_v40 = vsel %vm604_vm7, %v1649_v21, %v1658_v39  ;;  %vm1045_vm1 = vcmp.gt.f32.partialorder %v1033_v37, 0.0  ;;  %v1067_v55 = vsub.f32 1.0, %v2893_v42 }
 0x136   : > { %v1030_v32 = vpop.xlane.xlu0 %1029  ;;  %v1660_v35 = vsel %vm606_vm8, %v1653_v34, %v1659_v40  ;;  %v2895_v54 = vsel %vm1045_vm1, 1.0, %v3373_v15  ;;  %v1099_v17 = vrot.slane %v3907_v18, %v3764_v44 }
 0x137   : > { %vm1044_vm15 = vcmp.gt.f32.partialorder %v1030_v32, 0.0  ;;  %v1662_v46 = vsel %vm609_vm9, %v1660_v35, -inf  ;;  %v1075_v6 = vmul.f32 1000000.0, %v1067_v55  ;;  %v1069_v29 = vsub.f32 1.0, %v2895_v54 }
 0x138   : > { %1663 = vmax.xlane.f32.xlu1 %v1662_v46  ;;  %v2894_v56 = vsel %vm1044_vm15, 1.0, %v3373_v15  ;;  %v1036_v58 = vpop.xlane.xlu1 %1035 }
 0x139   : > { %vm1046_vm5 = vcmp.gt.f32.partialorder %v1036_v58, 0.0  ;;  %v1068_v2 = vsub.f32 1.0, %v2894_v56  ;;  %v1077_v24 = vmul.f32 1000000.0, %v1069_v29  ;;  %v3374_v29 = vmov 0  }
 0x13a   : > { %v981_v45 = vpop.xlane.xlu0 %980  ;;  %v2896_v9 = vsel %vm1046_vm5, 1.0, %v3373_v15  ;;  %3150 = vset.pattern.permute.xlu0 %v3374_v29  ;;  %3149 = vset.pattern.permute.xlu1 %v3374_v29 }
 0x13b   : > { %v1001_v60 = vadd.f32 %v981_v45, %v3747_v22  ;;  %v1076_v19 = vmul.f32 1000000.0, %v1068_v2  ;;  %v1070_v25 = vsub.f32 1.0, %v2896_v9  ;;  %v3952_v9 = vsub.s32 1, %v3752_v28 }
 0x13c   : > { %v1039_v11 = vpop.xlane.xlu1 %1038 }
 0x13d   : > { %v3901_v7 = vsub.f32 %v1001_v60, %v1073_v0  ;;  %vm1047_vm10 = vcmp.gt.f32.partialorder %v1039_v11, 0.0  ;;  %v1078_v41 = vmul.f32 1000000.0, %v1070_v25  ;;  %v3955_v11 = vsub.s32 5, %v3752_v28 }
 0x13e   : > { %v984_v61 = vpop.xlane.xlu0 %983  ;;  %v2897_v21 = vsel %vm1047_vm10, 1.0, %v3373_v15 }
 0x13f   : > { %v1002_v63 = vadd.f32 %v984_v61, %v3747_v22  ;;  %v1071_v30 = vsub.f32 1.0, %v2897_v21  ;;  %v1103_v32 = vrot.slane %v3901_v7, %v3764_v44 }
 0x140   : > { %v993_v33 = vpop.xlane.xlu1 %992 }
 0x141   : > { %v3904_v10 = vsub.f32 %v1002_v63, %v1074_v3  ;;  %v1005_v39 = vadd.f32 %v993_v33, %v3747_v22  ;;  %v1079_v42 = vmul.f32 1000000.0, %v1071_v30  ;;  %v1128_v46 = vsel %vm594_vm12, %v1103_v32, %v1099_v17 }
 0x142   : > { %v987_v13 = vpop.xlane.xlu0 %986  ;;  %v3971_v32 = vsub.s32 7, %v3752_v28 }
 0x143   : > { %v1003_v16 = vadd.f32 %v987_v13, %v3747_v22  ;;  %v1107_v34 = vrot.slane %v3904_v10, %v3764_v44  ;;  %v3922_v37 = vsub.f32 %v1005_v39, %v1077_v24  ;;  %v3958_v13 = vsub.s32 6, %v3752_v28 }
 0x144   : > { %v999_v51 = vpop.xlane.xlu1 %998 }
 0x145   : > { %v3910_v31 = vsub.f32 %v1003_v16, %v1075_v6  ;;  %v1129_v52 = vsel %vm596_vm2, %v1107_v34, %v1128_v46  ;;  %v1007_v56 = vadd.f32 %v999_v51, %v3747_v22  ;;  %v1119_v60 = vrot.slane %v3922_v37, %v3764_v44 }
 0x146   : > { %v990_v14 = vpop.xlane.xlu0 %989 }
 0x147   : > { %v1004_v40 = vadd.f32 %v990_v14, %v3747_v22  ;;  %v1111_v35 = vrot.slane %v3910_v31, %v3764_v44  ;;  %v3935_v58 = vsub.f32 %v1007_v56, %v1079_v42  ;;  %v3994_v56 = vsub.s32 3, %v3752_v28 }
 0x149   : > { %v3924_v45 = vsub.f32 %v1004_v40, %v1076_v19  ;;  %v1130_v54 = vsel %vm598_vm3, %v1111_v35, %v1129_v52  ;;  %v1127_v0 = vrot.slane %v3935_v58, %v3764_v44  ;;  %v3981_v35 = vsub.s32 2, %v3752_v28 }
 0x14a   : > { %v996_v62 = vpop.xlane.xlu0 %995 }
 0x14b   : > { %v1115_v55 = vrot.slane %v3924_v45, %v3764_v44  ;;  %v1006_v57 = vadd.f32 %v996_v62, %v3747_v22 }
 0x14d   : > { %v3937_v61 = vsub.f32 %v1006_v57, %v1078_v41  ;;  %v1131_v63 = vsel %vm600_vm4, %v1115_v55, %v1130_v54 }
 0x14e   : > { %v1132_v2 = vsel %vm602_vm6, %v1119_v60, %v1131_v63 }
 0x14f   : > { %v1123_v1 = vrot.slane %v3937_v61, %v3764_v44 }
 0x151   : > { %v1133_v22 = vsel %vm604_vm7, %v1123_v1, %v1132_v2  ;;  %v4011_v1 = vsub.s32 4, %v3752_v28 }
 0x152   : > { %v1134_v3 = vsel %vm606_vm8, %v1127_v0, %v1133_v22 }
 0x153   : > { %v1136_v6 = vsel %vm609_vm9, %v1134_v3, -inf }
 0x154   : > { %1137 = vmax.xlane.f32.xlu0 %v1136_v6 }
 0x1c1   : > { %v3960_v16 = vpop.xlane.xlu0 %611 }
 0x1c2   : > { %v617_v19 = vrot.slane %v3960_v16, %v3949_v8  ;;  %v621_v21 = vrot.slane %v3960_v16, %v3952_v9  ;;  %v637_v24 = vrot.slane %v3960_v16, %v3955_v11  ;;  %v641_v33 = vrot.slane %v3960_v16, %v3958_v13 }
 0x1c3   : > { %v625_v46 = vrot.slane %v3960_v16, %v3981_v35  ;;  %v633_v29 = vrot.slane %v3960_v16, %v4011_v1 }
 0x1c4   : > { %v654_v25 = vsub.f32 %v3770_v48, %v617_v19  ;;  %v655_v30 = vsub.f32 %v3768_v47, %v621_v21  ;;  %v659_v14 = vsub.f32 %v3822_v38, %v637_v24  ;;  %v645_v48 = vrot.slane %v3960_v16, %v3971_v32 }
 0x1c5   : > { %v3976_v34 = vpop.xlane.xlu1 %1663  ;;  %v660_v41 = vsub.f32 %v3837_v50, %v641_v33  ;;  %v656_v57 = vsub.f32 %v3807_v23, %v625_v46 }
 0x1c6   : > { %v662_v39 = vmul.f32 1.442695, %v654_v25  ;;  %v664_v40 = vmul.f32 1.442695, %v655_v30  ;;  %v1669_v17 = vrot.slane %v3976_v34, %v3949_v8  ;;  %v1673_v47 = vrot.slane %v3976_v34, %v3952_v9 }
 0x1c7   : > { %v672_v38 = vmul.f32 1.442695, %v659_v14  ;;  %v661_v62 = vsub.f32 %v3859_v4, %v645_v48  ;;  %v674_v52 = vmul.f32 1.442695, %v660_v41  ;;  %v1677_v50 = vrot.slane %v3976_v34, %v3981_v35 }
 0x1c8   : > { %3151 = vpow2.f32 %v662_v39  ;;  %v1706_v42 = vsub.f32 %v3801_v12, %v1669_v17  ;;  %v1707_v51 = vsub.f32 %v3805_v20, %v1673_v47  ;;  %v629_v4 = vrot.slane %v3960_v16, %v3994_v56 }
 0x1c9   : > { %3153 = vpow2.f32 %v664_v40  ;;  %v676_v54 = vmul.f32 1.442695, %v661_v62  ;;  %v666_v63 = vmul.f32 1.442695, %v656_v57  ;;  %v1708_v0 = vsub.f32 %v3831_v43, %v1677_v50 }
 0x1ca   : > { %3155 = vpow2.f32 %v672_v38  ;;  %v1714_v55 = vmul.f32 1.442695, %v1706_v42  ;;  %v1716_v12 = vmul.f32 1.442695, %v1707_v51  ;;  %v657_v2 = vsub.f32 %v3812_v27, %v629_v4 }
 0x1cb   : > { %v1681_v22 = vrot.slane %v3976_v34, %v3994_v56  ;;  %v1718_v3 = vmul.f32 1.442695, %v1708_v0  ;;  %v658_v30 = vsub.f32 %v3817_v36, %v633_v29  ;;  %v1689_v48 = vrot.slane %v3976_v34, %v3955_v11 }
 0x1cc   : > { %3157 = vpow2.f32 %v1714_v55  ;;  %v668_v28 = vmul.f32 1.442695, %v657_v2  ;;  %v1693_v46 = vrot.slane %v3976_v34, %v3958_v13 }
 0x1cd   : > { %3159 = vpow2.f32 %v674_v52  ;;  %v1709_v19 = vsub.f32 %v3835_v49, %v1681_v22  ;;  %v1685_v49 = vrot.slane %v3976_v34, %v4011_v1  ;;  %v670_v36 = vmul.f32 1.442695, %v658_v30 }
 0x1ce   : > { %3161 = vpow2.f32 %v1716_v12  ;;  %v1711_v51 = vsub.f32 %v3845_v59, %v1689_v48  ;;  %v1712_v57 = vsub.f32 %v3861_v5, %v1693_v46 }
 0x1cf   : > { %3163 = vpow2.f32 %v676_v54  ;;  %v1720_v33 = vmul.f32 1.442695, %v1709_v19  ;;  %v1710_v41 = vsub.f32 %v3839_v53, %v1685_v49 }
 0x1d0   : > { %3165 = vpow2.f32 %v666_v63  ;;  %v1724_v50 = vmul.f32 1.442695, %v1711_v51  ;;  %v1726_v4 = vmul.f32 1.442695, %v1712_v57 }
 0x1d1   : > { %3167 = vpow2.f32 %v1718_v3  ;;  %v1722_v62 = vmul.f32 1.442695, %v1710_v41 }
 0x1d2   : > { %v3999_v60 = vpop.eup %3151  ;;  %3169 = vpow2.f32 %v668_v28 }
 0x1d3   : > { %v4001_v20 = vpop.eup %3153  ;;  %687 = vperm.xlu1 %3149, %v3999_v60   ;;  %3171 = vpow2.f32 %v1720_v33 }
 0x1d4   : > { %690 = vperm.xlu0 %3150, %v4001_v20   ;;  %v4008_v23 = vpop.eup %3155 }
 0x1d6   : > { %v4017_v6 = vpop.eup %3157 }
 0x1d7   : > { %v4019_v43 = vpop.eup %3159  ;;  %1739 = vperm.xlu1 %3149, %v4017_v6  }
 0x1d8   : > { %702 = vperm.xlu0 %3150, %v4008_v23   ;;  %v4026_v27 = vpop.eup %3161 }
 0x1d9   : > { %v4030_v24 = vpop.eup %3163 }
 0x1da   : > { %v4045_v17 = vpop.eup %3165 }
 0x1db   : > { %1742 = vperm.xlu1 %3149, %v4026_v27  }
 0x1dc   : > { %705 = vperm.xlu0 %3150, %v4019_v43  }
 0x1df   : > { %693 = vperm.xlu1 %3149, %v4045_v17  }
 0x1e0   : > { %708 = vperm.xlu0 %3150, %v4030_v24  }
 0x1e1   : > { %v4028_v21 = vpop.xlane.xlu0 %1137 }
 0x1e2   : > { %v1143_v25 = vrot.slane %v4028_v21, %v3949_v8  ;;  %v1151_v16 = vrot.slane %v4028_v21, %v3981_v35  ;;  %v1159_v14 = vrot.slane %v4028_v21, %v4011_v1  ;;  %v1167_v38 = vrot.slane %v4028_v21, %v3958_v13 }
 0x1e3   : > { %v1147_v63 = vrot.slane %v4028_v21, %v3952_v9  ;;  %v1155_v2 = vrot.slane %v4028_v21, %v3994_v56  ;;  %v1163_v29 = vrot.slane %v4028_v21, %v3955_v11 }
 0x1e4   : > { %v1180_v39 = vsub.f32 %v3907_v18, %v1143_v25  ;;  %v1182_v40 = vsub.f32 %v3904_v10, %v1151_v16  ;;  %v1184_v42 = vsub.f32 %v3924_v45, %v1159_v14  ;;  %v4054_v10 = vpop.eup %3167  ;;  %v1186_v53 = vsub.f32 %v3937_v61, %v1167_v38 }
 0x1e5   : > { %1745 = vperm.xlu1 %3149, %v4054_v10   ;;  %v4061_v55 = vpop.eup %3169  ;;  %v1697_v45 = vrot.slane %v3976_v34, %v3971_v32  ;;  %v1183_v28 = vsub.f32 %v3910_v31, %v1155_v2  ;;  %v1171_v16 = vrot.slane %v4028_v21, %v3971_v32  ;;  %v1185_v30 = vsub.f32 %v3922_v37, %v1163_v29 }
 0x1e6   : > { %v1188_v47 = vmul.f32 1.442695, %v1180_v39  ;;  %v1192_v18 = vmul.f32 1.442695, %v1182_v40  ;;  %v1196_v52 = vmul.f32 1.442695, %v1184_v42  ;;  %v4067_v54 = vpop.eup %3171 }
 0x1e7   : > { %v1200_v12 = vmul.f32 1.442695, %v1186_v53  ;;  %v1713_v61 = vsub.f32 %v3878_v26, %v1697_v45  ;;  %v1181_v26 = vsub.f32 %v3901_v7, %v1147_v63  ;;  %v1194_v49 = vmul.f32 1.442695, %v1183_v28 }
 0x1e8   : > { %3173 = vpow2.f32 %v1188_v47  ;;  %v1187_v31 = vsub.f32 %v3935_v58, %v1171_v16  ;;  %v1198_v14 = vmul.f32 1.442695, %v1185_v30 }
 0x1e9   : > { %3175 = vpow2.f32 %v670_v36  ;;  %696 = vperm.xlu1 %3149, %v4061_v55   ;;  %v1728_v0 = vmul.f32 1.442695, %v1713_v61  ;;  %v1190_v19 = vmul.f32 1.442695, %v1181_v26 }
 0x1ea   : > { %3177 = vpow2.f32 %v1192_v18  ;;  %v1202_v21 = vmul.f32 1.442695, %v1187_v31 }
 0x1eb   : > { %3179 = vpow2.f32 %v1722_v62 }
 0x1ec   : > { %3181 = vpow2.f32 %v1196_v52 }
 0x1ed   : > { %1748 = vperm.xlu1 %3149, %v4067_v54   ;;  %3183 = vpow2.f32 %v1724_v50 }
 0x1ee   : > { %3185 = vpow2.f32 %v1200_v12 }
 0x1ef   : > { %3187 = vpow2.f32 %v1726_v4 }
 0x1f0   : > { %3189 = vpow2.f32 %v1728_v0 }
 0x1f1   : > { %3191 = vpow2.f32 %v1190_v19 }
 0x1f2   : > { %v4069_v59 = vpop.eup %3173  ;;  %3193 = vpow2.f32 %v1194_v49 }
 0x1f3   : > { %1213 = vperm.xlu0 %3150, %v4069_v59   ;;  %v4076_v5 = vpop.eup %3175  ;;  %3195 = vpow2.f32 %v1198_v14 }
 0x1f4   : > { %v4078_v34 = vpop.eup %3177  ;;  %699 = vperm.xlu1 %3149, %v4076_v5   ;;  %3197 = vpow2.f32 %v1202_v21 }
 0x1f5   : > { %v4085_v22 = vpop.eup %3179 }
 0x1f6   : > { %v4087_v3 = vpop.eup %3181 }
 0x1f7   : > { %1219 = vperm.xlu0 %3150, %v4078_v34   ;;  %v4094_v25 = vpop.eup %3183 }
 0x1f8   : > { %1751 = vperm.xlu1 %3149, %v4085_v22   ;;  %v4096_v7 = vpop.eup %3185 }
 0x1f9   : > { %v4103_v33 = vpop.eup %3187 }
 0x1fa   : > { %v4107_v39 = vpop.eup %3189 }
 0x1fb   : > { %1225 = vperm.xlu0 %3150, %v4087_v3   ;;  %v4110_v40 = vpop.eup %3191 }
 0x1fc   : > { %1754 = vperm.xlu1 %3149, %v4094_v25   ;;  %v4113_v37 = vpop.eup %3193 }
 0x1fd   : > { %v4116_v47 = vpop.eup %3195 }
 0x1fe   : > { %v4119_v58 = vpop.eup %3197 }
 0x1ff   : > { %1231 = vperm.xlu0 %3150, %v4096_v7  }
 0x200   : > { %1757 = vperm.xlu1 %3149, %v4103_v33  }
 0x204   : > { %1760 = vperm.xlu1 %3149, %v4107_v39  }
 0x208   : > { %1216 = vperm.xlu1 %3149, %v4110_v40  }
 0x20c   : > { %1222 = vperm.xlu1 %3149, %v4113_v37  }
 0x210   : > { %1228 = vperm.xlu1 %3149, %v4116_v47  }
 0x214   : > { %1234 = vperm.xlu1 %3149, %v4119_v58  }
 0x252   : > { %v688_v36 = vpop.permute.xlu1 %687 }
 0x253   : > { %v691_v38 = vpop.permute.xlu0 %690  ;;  %v713_v53 = vrot.slane %v688_v36, %v3764_v44 }
 0x254   : > { %v717_v52 = vrot.slane %v691_v38, %v3764_v44 }
 0x256   : > { %v1740_v48 = vpop.permute.xlu1 %1739  ;;  %v742_v12 = vsel %vm594_vm12, %v717_v52, %v713_v53 }
 0x257   : > { %v703_v46 = vpop.permute.xlu0 %702 }
 0x258   : > { %v733_v2 = vrot.slane %v703_v46, %v3764_v44 }
 0x25a   : > { %v1743_v41 = vpop.permute.xlu1 %1742 }
 0x25b   : > { %v706_v62 = vpop.permute.xlu0 %705  ;;  %v1769_v36 = vrot.slane %v1743_v41, %v3764_v44 }
 0x25c   : > { %v737_v29 = vrot.slane %v706_v62, %v3764_v44 }
 0x25e   : > { %v694_v42 = vpop.permute.xlu1 %693 }
 0x25f   : > { %v721_v57 = vrot.slane %v694_v42, %v3764_v44  ;;  %v709_v63 = vpop.permute.xlu0 %708  ;;  %v1765_v42 = vrot.slane %v1740_v48, %v3764_v44 }
 0x260   : > { %v741_v19 = vrot.slane %v709_v63, %v3764_v44 }
 0x261   : > { %v743_v4 = vsel %vm596_vm2, %v721_v57, %v742_v12  ;;  %v1794_v52 = vsel %vm594_vm12, %v1769_v36, %v1765_v42 }
 0x264   : > { %v1746_v18 = vpop.permute.xlu1 %1745 }
 0x265   : > { %v1773_v38 = vrot.slane %v1746_v18, %v3764_v44 }
 0x268   : > { %v697_v51 = vpop.permute.xlu1 %696 }
 0x269   : > { %v725_v50 = vrot.slane %v697_v51, %v3764_v44 }
 0x26b   : > { %v744_v26 = vsel %vm598_vm3, %v725_v50, %v743_v4  ;;  %v1795_v50 = vsel %vm596_vm2, %v1773_v38, %v1794_v52 }
 0x26c   : > { %v1749_v45 = vpop.permute.xlu1 %1748 }
 0x26d   : > { %v1777_v46 = vrot.slane %v1749_v45, %v3764_v44 }
 0x26f   : > { %v1796_v41 = vsel %vm598_vm3, %v1777_v46, %v1795_v50 }
 0x272   : > { %v1214_v51 = vpop.permute.xlu0 %1213 }
 0x273   : > { %v700_v61 = vpop.permute.xlu1 %699 }
 0x274   : > { %v729_v0 = vrot.slane %v700_v61, %v3764_v44 }
 0x276   : > { %v745_v28 = vsel %vm600_vm4, %v729_v0, %v744_v26  ;;  %v1220_v48 = vpop.permute.xlu0 %1219 }
 0x277   : > { %v1752_v16 = vpop.permute.xlu1 %1751  ;;  %v746_v30 = vsel %vm602_vm6, %v733_v2, %v745_v28 }
 0x278   : > { %v747_v49 = vsel %vm604_vm7, %v737_v29, %v746_v30  ;;  %v1781_v62 = vrot.slane %v1752_v16, %v3764_v44  ;;  %v1239_v29 = vrot.slane %v1214_v51, %v3764_v44  ;;  %v1247_v30 = vrot.slane %v1220_v48, %v3764_v44 }
 0x279   : > { %v748_v31 = vsel %vm606_vm8, %v741_v19, %v747_v49 }
 0x27a   : > { %v750_v14 = vsel %vm609_vm9, %v748_v31, 0.0  ;;  %v1797_v18 = vsel %vm600_vm4, %v1781_v62, %v1796_v41  ;;  %v1226_v19 = vpop.permute.xlu0 %1225 }
 0x27b   : > { %v1755_v21 = vpop.permute.xlu1 %1754  ;;  %751 = vadd.xlane.f32.xlu0 %v750_v14  ;;  %v1255_v36 = vrot.slane %v1226_v19, %v3764_v44 }
 0x27c   : > { %v1785_v57 = vrot.slane %v1755_v21, %v3764_v44 }
 0x27e   : > { %v1798_v45 = vsel %vm602_vm6, %v1785_v57, %v1797_v18  ;;  %v1232_v42 = vpop.permute.xlu0 %1231 }
 0x27f   : > { %v1758_v53 = vpop.permute.xlu1 %1757 }
 0x280   : > { %v1789_v12 = vrot.slane %v1758_v53, %v3764_v44  ;;  %v1263_v53 = vrot.slane %v1232_v42, %v3764_v44 }
 0x282   : > { %v1799_v63 = vsel %vm604_vm7, %v1789_v12, %v1798_v45 }
 0x283   : > { %v1761_v61 = vpop.permute.xlu1 %1760 }
 0x284   : > { %v1793_v4 = vrot.slane %v1761_v61, %v3764_v44 }
 0x286   : > { %v1800_v0 = vsel %vm606_vm8, %v1793_v4, %v1799_v63 }
 0x287   : > { %v1217_v2 = vpop.permute.xlu1 %1216  ;;  %v1802_v26 = vsel %vm609_vm9, %v1800_v0, 0.0 }
 0x288   : > { %v1243_v28 = vrot.slane %v1217_v2, %v3764_v44  ;;  %1803 = vadd.xlane.f32.xlu1 %v1802_v26 }
 0x28a   : > { %v1268_v16 = vsel %vm594_vm12, %v1243_v28, %v1239_v29 }
 0x28b   : > { %v1223_v49 = vpop.permute.xlu1 %1222  ;;  %v1269_v14 = vsel %vm596_vm2, %v1247_v30, %v1268_v16 }
 0x28c   : > { %v1251_v31 = vrot.slane %v1223_v49, %v3764_v44 }
 0x28e   : > { %v1270_v21 = vsel %vm598_vm3, %v1251_v31, %v1269_v14 }
 0x28f   : > { %v1229_v38 = vpop.permute.xlu1 %1228  ;;  %v1271_v51 = vsel %vm600_vm4, %v1255_v36, %v1270_v21 }
 0x290   : > { %v1259_v46 = vrot.slane %v1229_v38, %v3764_v44 }
 0x292   : > { %v1272_v62 = vsel %vm602_vm6, %v1259_v46, %v1271_v51 }
 0x293   : > { %v1235_v52 = vpop.permute.xlu1 %1234  ;;  %v1273_v50 = vsel %vm604_vm7, %v1263_v53, %v1272_v62 }
 0x294   : > { %v1267_v57 = vrot.slane %v1235_v52, %v3764_v44 }
 0x296   : > { %v1274_v12 = vsel %vm606_vm8, %v1267_v57, %v1273_v50 }
 0x297   : > { %v1276_v41 = vsel %vm609_vm9, %v1274_v12, 0.0  ;;  %vm3376_vm9 = vmmov 0  }
 0x298   : > { %1277 = vadd.xlane.f32.xlu0 %v1276_v41  ;;  %v3215_v41 = vld [vmem:[%s3599_s23 + $0x8] sm:$0xff]  ;;  %2985 = vmatprep.mubr.msk.f32.mxu0 %vm3376_vm9, %v3373_v15 }
 0x299   : > { %2963 = vmatprep.mubr.msk.f32.mxu1 %vm3376_vm9, %v3373_v15 }
 0x308   : > { %v752_v18 = vpop.xlane.xlu0 %751 }
 0x309   : > { %3199 = vrcp.f32 %v752_v18 }
 0x313   : > { %v3200_v61 = vpop.eup %3199 }
 0x314   : > { %v762_v48 = vrot.slane %v3200_v61, %v3952_v9  ;;  %v758_v45 = vrot.slane %v3200_v61, %v3949_v8  ;;  %v766_v19 = vrot.slane %v3200_v61, %v3981_v35  ;;  %v770_v30 = vrot.slane %v3200_v61, %v3994_v56 }
 0x315   : > { %v1804_v4 = vpop.xlane.xlu1 %1803  ;;  %v774_v14 = vrot.slane %v3200_v61, %v4011_v1  ;;  %v778_v36 = vrot.slane %v3200_v61, %v3955_v11  ;;  %v782_v42 = vrot.slane %v3200_v61, %v3958_v13  ;;  %v786_v51 = vrot.slane %v3200_v61, %v3971_v32 }
 0x316   : > { %3201 = vrcp.f32 %v1804_v4  ;;  %v796_v63 = vmul.f32 %v4001_v20, %v762_v48  ;;  %v795_v44 = vmul.f32 %v3999_v60, %v758_v45  ;;  %v797_v20 = vmul.f32 %v4045_v17, %v766_v19 }
 0x317   : > { %v799_v17 = vmul.f32 %v4076_v5, %v774_v14  ;;  %v801_v5 = vmul.f32 %v4019_v43, %v782_v42  ;;  %v3219_v14 = vld [vmem:[%s3599_s23 + $0x10] sm:$0xff] }
 0x318   : > { %810 = vperm.xlu1 %3149, %v796_v63   ;;  %805 = vperm.xlu0 %3150, %v795_v44  }
 0x320   : > { %v3202_v0 = vpop.eup %3201 }
 0x321   : > { %v1810_v2 = vrot.slane %v3202_v0, %v3949_v8  ;;  %v1814_v26 = vrot.slane %v3202_v0, %v3952_v9  ;;  %v1818_v16 = vrot.slane %v3202_v0, %v3981_v35  ;;  %v1822_v49 = vrot.slane %v3202_v0, %v3994_v56 }
 0x322   : > { %v1826_v21 = vrot.slane %v3202_v0, %v4011_v1  ;;  %v1830_v38 = vrot.slane %v3202_v0, %v3955_v11  ;;  %v1834_v46 = vrot.slane %v3202_v0, %v3958_v13  ;;  %v1838_v62 = vrot.slane %v3202_v0, %v3971_v32 }
 0x323   : > { %v1847_v29 = vmul.f32 %v4017_v6, %v1810_v2  ;;  %v1848_v28 = vmul.f32 %v4026_v27, %v1814_v26  ;;  %v1849_v60 = vmul.f32 %v4054_v10, %v1818_v16  ;;  %v798_v6 = vmul.f32 %v4061_v55, %v770_v30  ;;  %v3217_v26 = vld [vmem:[%s3580_s22] sm:$0xff] }
 0x324   : > { %v1850_v27 = vmul.f32 %v4067_v54, %v1822_v49  ;;  %v1851_v10 = vmul.f32 %v4085_v22, %v1826_v21  ;;  %v800_v55 = vmul.f32 %v4008_v23, %v778_v36  ;;  %v1852_v54 = vmul.f32 %v4094_v25, %v1830_v38 }
 0x325   : > { %1857 = vperm.xlu1 %3149, %v1847_v29   ;;  %1862 = vperm.xlu0 %3150, %v1848_v28   ;;  %v1278_v31 = vpop.xlane.xlu0 %1277  ;;  %v1853_v22 = vmul.f32 %v4103_v33, %v1834_v46  ;;  %v802_v23 = vmul.f32 %v4030_v24, %v786_v51  ;;  %v1854_v25 = vmul.f32 %v4107_v39, %v1838_v62  ;;  %v3218_v28 = vld [vmem:[%s3580_s22 + $0x8] sm:$0xff] }
 0x326   : > { %3203 = vrcp.f32 %v1278_v31 }
 0x329   : > { %815 = vperm.xlu1 %3149, %v797_v20   ;;  %1867 = vperm.xlu0 %3150, %v1849_v60  }
 0x32d   : > { %820 = vperm.xlu1 %3149, %v798_v6   ;;  %1872 = vperm.xlu0 %3150, %v1850_v27  }
 0x330   : > { %v3204_v53 = vpop.eup %3203 }
 0x331   : > { %825 = vperm.xlu1 %3149, %v799_v17   ;;  %1877 = vperm.xlu0 %3150, %v1851_v10   ;;  %v1288_v52 = vrot.slane %v3204_v53, %v3952_v9  ;;  %v1284_v57 = vrot.slane %v3204_v53, %v3949_v8  ;;  %v1296_v50 = vrot.slane %v3204_v53, %v3994_v56  ;;  %v3220_v17 = vld [vmem:[%s3580_s22 + $0x10] sm:$0xff] }
 0x332   : > { %v1292_v12 = vrot.slane %v3204_v53, %v3981_v35  ;;  %v1304_v9 = vrot.slane %v3204_v53, %v3955_v11  ;;  %v1300_v8 = vrot.slane %v3204_v53, %v4011_v1  ;;  %v1312_v35 = vrot.slane %v3204_v53, %v3971_v32 }
 0x333   : > { %v1322_v43 = vmul.f32 %v4110_v40, %v1288_v52  ;;  %v1321_v33 = vmul.f32 %v4069_v59, %v1284_v57  ;;  %v1324_v24 = vmul.f32 %v4113_v37, %v1296_v50  ;;  %v1308_v40 = vrot.slane %v3204_v53, %v3958_v13  ;;  %v3222_v57 = vld [vmem:[%s3580_s22 + $0x18] sm:$0xff] }
 0x334   : > { %v1323_v39 = vmul.f32 %v4078_v34, %v1292_v12  ;;  %v1326_v59 = vmul.f32 %v4116_v47, %v1304_v9  ;;  %v1325_v56 = vmul.f32 %v4087_v3, %v1300_v8  ;;  %v1328_v34 = vmul.f32 %v4119_v58, %v1312_v35  ;;  %v3216_v47 = vld [vmem:[%s3599_s23] sm:$0xff] }
 0x335   : > { %830 = vperm.xlu1 %3149, %v800_v55   ;;  %1882 = vperm.xlu0 %3150, %v1852_v54   ;;  %v1327_v11 = vmul.f32 %v4096_v7, %v1308_v40 }
 0x339   : > { %835 = vperm.xlu1 %3149, %v801_v5   ;;  %1887 = vperm.xlu0 %3150, %v1853_v22  }
 0x33d   : > { %840 = vperm.xlu1 %3149, %v802_v23   ;;  %1892 = vperm.xlu0 %3150, %v1854_v25   ;;  %v3221_v25 = vld [vmem:[%s3599_s23 + $0x18] sm:$0xff] }
 0x341   : > { %1336 = vperm.xlu0 %3150, %v1322_v43   ;;  %1331 = vperm.xlu1 %3149, %v1321_v33  }
 0x345   : > { %1346 = vperm.xlu0 %3150, %v1324_v24   ;;  %1341 = vperm.xlu1 %3149, %v1323_v39  }
 0x349   : > { %1356 = vperm.xlu0 %3150, %v1326_v59   ;;  %1351 = vperm.xlu1 %3149, %v1325_v56  }
 0x34d   : > { %1366 = vperm.xlu0 %3150, %v1328_v34   ;;  %1361 = vperm.xlu1 %3149, %v1327_v11  }
 0x397   : > { %v811_v1 = vpop.permute.xlu1 %810  ;;  %v806_v37 = vpop.permute.xlu0 %805 }
 0x398   : > { %v844_v18 = vmul.f32 %v3215_v41, %v811_v1  ;;  %v843_v3 = vmul.f32 %v3216_v47, %v806_v37 }
 0x39a   : > { %v858_v32 = vsel %vm438_vm0, %v844_v18, 0.0  ;;  %v851_v13 = vsel %vm438_vm0, %v843_v3, 0.0  ;;  %v3223_v18 = vld [vmem:[%s3599_s23 + $0x20] sm:$0xff] }
 0x39b   : > { %v859_v61 = vrot.slane %v858_v32, 4  ;;  %v852_v48 = vrot.slane %v851_v13, 4  ;;  %v3224_v3 = vld [vmem:[%s3580_s22 + $0x20] sm:$0xff] }
 0x39d   : > { %v860_v45 = vadd.f32 %v859_v61, %v858_v32  ;;  %v853_v58 = vadd.f32 %v852_v48, %v851_v13 }
 0x39f   : > { %v861_v4 = vrot.slane %v860_v45, 2  ;;  %v854_v7 = vrot.slane %v853_v58, 2 }
 0x3a1   : > { %v862_v63 = vadd.f32 %v861_v4, %v860_v45  ;;  %v855_v44 = vadd.f32 %v854_v7, %v853_v58 }
 0x3a3   : > { %v863_v16 = vrot.slane %v862_v63, 1  ;;  %v856_v20 = vrot.slane %v855_v44, 1 }
 0x3a4   : > { %v1858_v0 = vpop.permute.xlu1 %1857  ;;  %v1863_v2 = vpop.permute.xlu0 %1862 }
 0x3a5   : > { %v1895_v29 = vmul.f32 %v3217_v26, %v1858_v0  ;;  %v1896_v19 = vmul.f32 %v3218_v28, %v1863_v2  ;;  %v4228_v55 = vadd.f32 %v863_v16, %v862_v63  ;;  %v4230_v54 = vadd.f32 %v856_v20, %v855_v44 }
 0x3a7   : > { %v1903_v60 = vsel %vm438_vm0, %v1895_v29, 0.0  ;;  %v1910_v30 = vsel %vm438_vm0, %v1896_v19, 0.0  ;;  %v908_v39 = vmul.f32 %v4228_v55, %v4228_v55  ;;  %v907_v9 = vmul.f32 %v4230_v54, %v4230_v54 }
 0x3a8   : > { %v1904_v49 = vrot.slane %v1903_v60, 4  ;;  %v1911_v31 = vrot.slane %v1910_v30, 4  ;;  %v816_v6 = vpop.permute.xlu1 %815  ;;  %v1868_v27 = vpop.permute.xlu0 %1867 }
 0x3a9   : > { %v845_v21 = vmul.f32 %v3219_v14, %v816_v6  ;;  %v1897_v10 = vmul.f32 %v3220_v17, %v1868_v27  ;;  %v3225_v6 = vld [vmem:[%s3599_s23 + $0x28] sm:$0xff] }
 0x3aa   : > { %v1905_v36 = vadd.f32 %v1904_v49, %v1903_v60  ;;  %v1912_v38 = vadd.f32 %v1911_v31, %v1910_v30  ;;  %v4255_v30 = vsel %vm594_vm12, %v908_v39, %v907_v9 }
 0x3ab   : > { %v865_v42 = vsel %vm438_vm0, %v845_v21, 0.0  ;;  %v1917_v46 = vsel %vm438_vm0, %v1897_v10, 0.0 }
 0x3ac   : > { %v1906_v5 = vrot.slane %v1905_v36, 2  ;;  %v1913_v22 = vrot.slane %v1912_v38, 2  ;;  %v866_v51 = vrot.slane %v865_v42, 4  ;;  %v1918_v62 = vrot.slane %v1917_v46, 4  ;;  %v821_v53 = vpop.permute.xlu1 %820  ;;  %v1873_v23 = vpop.permute.xlu0 %1872 }
 0x3ad   : > { %v846_v52 = vmul.f32 %v3221_v25, %v821_v53  ;;  %v1898_v43 = vmul.f32 %v3222_v57, %v1873_v23 }
 0x3ae   : > { %v1907_v33 = vadd.f32 %v1906_v5, %v1905_v36  ;;  %v1914_v50 = vadd.f32 %v1913_v22, %v1912_v38  ;;  %v867_v12 = vadd.f32 %v866_v51, %v865_v42  ;;  %v1919_v24 = vadd.f32 %v1918_v62, %v1917_v46  ;;  %v3226_v46 = vld [vmem:[%s3580_s22 + $0x28] sm:$0xff] }
 0x3af   : > { %v872_v8 = vsel %vm438_vm0, %v846_v52, 0.0  ;;  %v1924_v59 = vsel %vm438_vm0, %v1898_v43, 0.0  ;;  %v3227_v43 = vld [vmem:[%s3599_s23 + $0x30] sm:$0xff] }
 0x3b0   : > { %v1908_v56 = vrot.slane %v1907_v33, 1  ;;  %v1915_v35 = vrot.slane %v1914_v50, 1  ;;  %v868_v40 = vrot.slane %v867_v12, 2  ;;  %v1920_v34 = vrot.slane %v1919_v24, 2  ;;  %v826_v11 = vpop.permute.xlu1 %825  ;;  %v1878_v1 = vpop.permute.xlu0 %1877 }
 0x3b1   : > { %v873_v37 = vrot.slane %v872_v8, 4  ;;  %v1925_v41 = vrot.slane %v1924_v59, 4  ;;  %v847_v47 = vmul.f32 %v3223_v18, %v826_v11  ;;  %v1899_v32 = vmul.f32 %v3224_v3, %v1878_v1 }
 0x3b2   : > { %v4244_v13 = vadd.f32 %v1908_v56, %v1907_v33  ;;  %v4246_v61 = vadd.f32 %v1915_v35, %v1914_v50  ;;  %v869_v48 = vadd.f32 %v868_v40, %v867_v12  ;;  %v1921_v45 = vadd.f32 %v1920_v34, %v1919_v24  ;;  %v3228_v50 = vld [vmem:[%s3580_s22 + $0x30] sm:$0xff] }
 0x3b3   : > { %v874_v58 = vadd.f32 %v873_v37, %v872_v8  ;;  %v1926_v4 = vadd.f32 %v1925_v41, %v1924_v59  ;;  %v879_v7 = vsel %vm438_vm0, %v847_v47, 0.0  ;;  %v1931_v63 = vsel %vm438_vm0, %v1899_v32, 0.0 }
 0x3b4   : > { %v1959_v44 = vmul.f32 %v4244_v13, %v4244_v13  ;;  %v1960_v0 = vmul.f32 %v4246_v61, %v4246_v61  ;;  %v870_v2 = vrot.slane %v869_v48, 1  ;;  %v1922_v26 = vrot.slane %v1921_v45, 1  ;;  %v831_v29 = vpop.permute.xlu1 %830  ;;  %v1883_v28 = vpop.permute.xlu0 %1882 }
 0x3b5   : > { %v875_v19 = vrot.slane %v874_v58, 2  ;;  %v1927_v16 = vrot.slane %v1926_v4, 2  ;;  %v880_v20 = vrot.slane %v879_v7, 4  ;;  %v1932_v60 = vrot.slane %v1931_v63, 4 }
 0x3b6   : > { %v4258_v49 = vsel %vm594_vm12, %v1960_v0, %v1959_v44  ;;  %v4260_v31 = vadd.f32 %v870_v2, %v869_v48  ;;  %v848_v27 = vmul.f32 %v3225_v6, %v831_v29  ;;  %v4267_v38 = vadd.f32 %v1922_v26, %v1921_v45 }
 0x3b7   : > { %v876_v14 = vadd.f32 %v875_v19, %v874_v58  ;;  %v1928_v21 = vadd.f32 %v1927_v16, %v1926_v4  ;;  %v881_v17 = vadd.f32 %v880_v20, %v879_v7  ;;  %v1933_v10 = vadd.f32 %v1932_v60, %v1931_v63  ;;  %v3229_v4 = vld [vmem:[%s3599_s23 + $0x38] sm:$0xff] }
 0x3b8   : > { %v4265_v36 = vmul.f32 %v4260_v31, %v4260_v31  ;;  %v886_v42 = vsel %vm438_vm0, %v848_v27, 0.0  ;;  %v1900_v5 = vmul.f32 %v3226_v46, %v1883_v28  ;;  %v836_v22 = vpop.permute.xlu1 %835  ;;  %v1888_v51 = vpop.permute.xlu0 %1887  ;;  %v4282_v1 = vmul.f32 %v4267_v38, %v4267_v38  ;;  %v3230_v63 = vld [vmem:[%s3580_s22 + $0x38] sm:$0xff]  ;;  %s2916_s22 = sshll.u32 %s3452_s4, 7  ;;  %s3377_s4 = smov [#allocation8]  }
 0x3b9   : > { %v877_v62 = vrot.slane %v876_v14, 1  ;;  %v1929_v53 = vrot.slane %v1928_v21, 1  ;;  %v882_v23 = vrot.slane %v881_v17, 2  ;;  %v1934_v25 = vrot.slane %v1933_v10, 2  ;;  %v3231_v46 = vld [vmem:[%s3671_s19] sm:$0xff]  ;;  %s4773_s23 = scalar_lea.hbm %s4826_s9, %s2916_s22  ;;  %s3301_s30 = sshll.u32 %s3377_s4, 4  ;;  %s3302_s30 = int_to_ptr.vmem [resolvable:$false] %s3301_s30 }
 0x3ba   : > { %v887_v52 = vrot.slane %v886_v42, 4  ;;  %v1938_v57 = vsel %vm438_vm0, %v1900_v5, 0.0  ;;  %v849_v33 = vmul.f32 %v3227_v43, %v836_v22  ;;  %v1901_v12 = vmul.f32 %v3228_v50, %v1888_v51  ;;  %v3232_v22 = vld [vmem:[%s3671_s19 + $0x8] sm:$0xff]  ;;  %s3303_s15 = scalar_lea.vmem %s3302_s30, 256  ;;  %p3304_p13 = scmp.lt.s32.totalorder %s4775_s25, %s3302_s30 }
 0x3bb   : > { %v4274_v24 = vadd.f32 %v877_v62, %v876_v14  ;;  %v4276_v39 = vadd.f32 %v1929_v53, %v1928_v21  ;;  %v883_v9 = vadd.f32 %v882_v23, %v881_v17  ;;  %v1935_v8 = vadd.f32 %v1934_v25, %v1933_v10  ;;  %p3305_p3 = scmp.lt.s32.totalorder %s3303_s15, %s3297_s27 }
 0x3bc   : > { %v888_v59 = vadd.f32 %v887_v52, %v886_v42  ;;  %v1939_v56 = vrot.slane %v1938_v57, 4  ;;  %v893_v35 = vsel %vm438_vm0, %v849_v33, 0.0  ;;  %v1945_v40 = vsel %vm438_vm0, %v1901_v12, 0.0  ;;  %v841_v34 = vpop.permute.xlu1 %840  ;;  %v1893_v11 = vpop.permute.xlu0 %1892 }
 0x3bd   : > { %v4286_v37 = vmul.f32 %v4274_v24, %v4274_v24  ;;  %v884_v41 = vrot.slane %v883_v9, 1  ;;  %v1936_v18 = vrot.slane %v1935_v8, 1  ;;  %v894_v32 = vrot.slane %v893_v35, 4  ;;  %p3306_p7 = por %p3305_p3, %p3304_p13 }
 0x3be   : > { %v889_v47 = vrot.slane %v888_v59, 2  ;;  %v1940_v3 = vadd.f32 %v1939_v56, %v1938_v57  ;;  %v1946_v48 = vrot.slane %v1945_v40, 4  ;;  %v4290_v45 = vmul.f32 %v4276_v39, %v4276_v39 }
 0x3bf   : > { %v4292_v58 = vadd.f32 %v884_v41, %v883_v9  ;;  %v850_v7 = vmul.f32 %v3229_v4, %v841_v34  ;;  %v1902_v44 = vmul.f32 %v3230_v63, %v1893_v11  ;;  %v895_v26 = vadd.f32 %v894_v32, %v893_v35  ;;  %p3307_p9 = pnand %p3306_p7, %p3300_p10 }
 0x3c0   : > { %v890_v0 = vadd.f32 %v889_v47, %v888_v59  ;;  %v1941_v2 = vrot.slane %v1940_v3, 2  ;;  %v1947_v29 = vadd.f32 %v1946_v48, %v1945_v40  ;;  %v1332_v28 = vpop.permute.xlu1 %1331  ;;  %v1337_v19 = vpop.permute.xlu0 %1336  ;;  %v4300_v20 = vadd.f32 %v1936_v18, %v1935_v8 }
 0x3c1   : > { %v4298_v16 = vmul.f32 %v4292_v58, %v4292_v58  ;;  %v900_v60 = vsel %vm438_vm0, %v850_v7, 0.0  ;;  %v1952_v6 = vsel %vm438_vm0, %v1902_v44, 0.0  ;;  %v896_v21 = vrot.slane %v895_v26, 2 }
 0x3c2   : > { %v891_v27 = vrot.slane %v890_v0, 1  ;;  %v1942_v14 = vadd.f32 %v1941_v2, %v1940_v3  ;;  %v1948_v17 = vrot.slane %v1947_v29, 2  ;;  %v901_v10 = vrot.slane %v900_v60, 4  ;;  %v3233_v3 = vld [vmem:[%s3671_s19 + $0x10] sm:$0xff] }
 0x3c3   : > { %v1953_v42 = vrot.slane %v1952_v6, 4  ;;  %v1369_v5 = vmul.f32 %v3231_v46, %v1332_v28  ;;  %v1370_v51 = vmul.f32 %v3232_v22, %v1337_v19  ;;  %v897_v23 = vadd.f32 %v896_v21, %v895_v26  ;;  %v3234_v26 = vld [vmem:[%s3671_s19 + $0x18] sm:$0xff]  ;;  %v3235_v28 = vld [vmem:[%s3671_s19 + $0x20] sm:$0xff] }
 0x3c4   : > { %v4306_v62 = vadd.f32 %v891_v27, %v890_v0  ;;  %v1943_v53 = vrot.slane %v1942_v14, 1  ;;  %v1949_v25 = vadd.f32 %v1948_v17, %v1947_v29  ;;  %v1342_v52 = vpop.permute.xlu1 %1341  ;;  %v1347_v57 = vpop.permute.xlu0 %1346  ;;  %v902_v43 = vadd.f32 %v901_v10, %v900_v60  ;;  %v3236_v60 = vld [vmem:[%s3671_s19 + $0x28] sm:$0xff] }
 0x3c5   : > { %v1954_v33 = vadd.f32 %v1953_v42, %v1952_v6  ;;  %v1377_v50 = vsel %vm438_vm0, %v1369_v5, 0.0  ;;  %v1384_v12 = vsel %vm438_vm0, %v1370_v51, 0.0  ;;  %v4312_v9 = vmul.f32 %v4300_v20, %v4300_v20 }
 0x3c6   : > { %v4314_v8 = vadd.f32 %v1943_v53, %v1942_v14  ;;  %v898_v59 = vrot.slane %v897_v23, 1  ;;  %v1950_v56 = vrot.slane %v1949_v25, 1  ;;  %v903_v35 = vrot.slane %v902_v43, 2 }
 0x3c7   : > { %v1955_v40 = vrot.slane %v1954_v33, 2  ;;  %v1378_v34 = vrot.slane %v1377_v50, 4  ;;  %v1385_v11 = vrot.slane %v1384_v12, 4  ;;  %v4318_v41 = vmul.f32 %v4306_v62, %v4306_v62 }
 0x3c8   : > { %v4322_v18 = vmul.f32 %v4314_v8, %v4314_v8  ;;  %v4324_v47 = vadd.f32 %v898_v59, %v897_v23  ;;  %v1371_v32 = vmul.f32 %v3233_v3, %v1342_v52  ;;  %v1352_v48 = vpop.permute.xlu1 %1351  ;;  %v1357_v4 = vpop.permute.xlu0 %1356  ;;  %v904_v7 = vadd.f32 %v903_v35, %v902_v43 }
 0x3c9   : > { %v1956_v63 = vadd.f32 %v1955_v40, %v1954_v33  ;;  %v1379_v44 = vadd.f32 %v1378_v34, %v1377_v50  ;;  %v1386_v0 = vadd.f32 %v1385_v11, %v1384_v12  ;;  %v1372_v29 = vmul.f32 %v3234_v26, %v1347_v57  ;;  %v3238_v40 = vld [vmem:[%s3671_s19 + $0x38] sm:$0xff] }
 0x3ca   : > { %v1391_v2 = vsel %vm438_vm0, %v1371_v32, 0.0  ;;  %v1373_v19 = vmul.f32 %v3235_v28, %v1352_v48  ;;  %v1374_v6 = vmul.f32 %v3236_v60, %v1357_v4  ;;  %v4331_v27 = vadd.f32 %v1950_v56, %v1949_v25  ;;  %v3237_v56 = vld [vmem:[%s3671_s19 + $0x30] sm:$0xff] }
 0x3cb   : > { %v905_v14 = vrot.slane %v904_v7, 1  ;;  %v1380_v21 = vrot.slane %v1379_v44, 2  ;;  %v1387_v17 = vrot.slane %v1386_v0, 2  ;;  %v1392_v10 = vrot.slane %v1391_v2, 4 }
 0x3cc   : > { %v1398_v42 = vsel %vm438_vm0, %v1372_v29, 0.0  ;;  %v1405_v46 = vsel %vm438_vm0, %v1373_v19, 0.0  ;;  %v1412_v5 = vsel %vm438_vm0, %v1374_v6, 0.0  ;;  %v1362_v22 = vpop.permute.xlu1 %1361  ;;  %v1367_v51 = vpop.permute.xlu0 %1366  ;;  %v1957_v23 = vrot.slane %v1956_v63, 1 }
 0x3cd   : > { %v4336_v53 = vadd.f32 %v905_v14, %v904_v7  ;;  %v1381_v52 = vadd.f32 %v1380_v21, %v1379_v44  ;;  %v1388_v25 = vadd.f32 %v1387_v17, %v1386_v0  ;;  %v1393_v57 = vadd.f32 %v1392_v10, %v1391_v2 }
 0x3ce   : > { %v1399_v43 = vrot.slane %v1398_v42, 4  ;;  %v1406_v33 = vrot.slane %v1405_v46, 4  ;;  %v1413_v50 = vrot.slane %v1412_v5, 4  ;;  %v1375_v35 = vmul.f32 %v3237_v56, %v1362_v22 }
 0x3cf   : > { %v1382_v12 = vrot.slane %v1381_v52, 1  ;;  %v1389_v59 = vrot.slane %v1388_v25, 1  ;;  %v1376_v34 = vmul.f32 %v3238_v40, %v1367_v51  ;;  %v1394_v11 = vrot.slane %v1393_v57, 2 }
 0x3d0   : > { %v1400_v3 = vadd.f32 %v1399_v43, %v1398_v42  ;;  %v1407_v32 = vadd.f32 %v1406_v33, %v1405_v46  ;;  %v1414_v48 = vadd.f32 %v1413_v50, %v1412_v5  ;;  %v1419_v44 = vsel %vm438_vm0, %v1375_v35, 0.0 }
 0x3d1   : > { %v4340_v4 = vadd.f32 %v1382_v12, %v1381_v52  ;;  %v4342_v7 = vadd.f32 %v1389_v59, %v1388_v25  ;;  %v1426_v0 = vsel %vm438_vm0, %v1376_v34, 0.0  ;;  %v1395_v2 = vadd.f32 %v1394_v11, %v1393_v57 }
 0x3d2   : > { %v1401_v26 = vrot.slane %v1400_v3, 2  ;;  %v1408_v29 = vrot.slane %v1407_v32, 2  ;;  %v1415_v28 = vrot.slane %v1414_v48, 2  ;;  %v1420_v6 = vrot.slane %v1419_v44, 4 }
 0x3d3   : > { %v1433_v19 = vmul.f32 %v4340_v4, %v4340_v4  ;;  %v1434_v60 = vmul.f32 %v4342_v7, %v4342_v7  ;;  %v1427_v14 = vrot.slane %v1426_v0, 4  ;;  %v1396_v21 = vrot.slane %v1395_v2, 1 }
 0x3d4   : > { %v1402_v17 = vadd.f32 %v1401_v26, %v1400_v3  ;;  %v1409_v10 = vadd.f32 %v1408_v29, %v1407_v32  ;;  %v1416_v42 = vadd.f32 %v1415_v28, %v1414_v48  ;;  %v4350_v46 = vadd.f32 %v1957_v23, %v1956_v63 }
 0x3d5   : > { %v1449_v5 = vsel %vm594_vm12, %v1434_v60, %v1433_v19  ;;  %v1421_v22 = vadd.f32 %v1420_v6, %v1419_v44  ;;  %v1428_v51 = vadd.f32 %v1427_v14, %v1426_v0  ;;  %v4353_v52 = vadd.f32 %v1396_v21, %v1395_v2 }
 0x3d6   : > { %v1403_v25 = vrot.slane %v1402_v17, 1  ;;  %v1410_v57 = vrot.slane %v1409_v10, 1  ;;  %v1417_v43 = vrot.slane %v1416_v42, 1  ;;  %v913_v12 = vmul.f32 %v4324_v47, %v4324_v47 }
 0x3d7   : > { %v1422_v33 = vrot.slane %v1421_v22, 2  ;;  %v1429_v50 = vrot.slane %v1428_v51, 2  ;;  %v924_v59 = vsel %vm596_vm2, %v4265_v36, %v4255_v30  ;;  %v1435_v63 = vmul.f32 %v4353_v52, %v4353_v52 }
 0x3d8   : > { %v4362_v23 = vadd.f32 %v1403_v25, %v1402_v17  ;;  %v4364_v56 = vadd.f32 %v1410_v57, %v1409_v10  ;;  %v4366_v35 = vadd.f32 %v1417_v43, %v1416_v42  ;;  %v914_v11 = vmul.f32 %v4336_v53, %v4336_v53  ;;  %v2265_v57 = vld [vmem:[%s4822_s5 + $0x40] sm:$0xff]  ;;  %v2266_v43 = vld [vmem:[%s4822_s5 + $0x48] sm:$0xff] }
 0x3d9   : > { %v1423_v40 = vadd.f32 %v1422_v33, %v1421_v22  ;;  %v1430_v34 = vadd.f32 %v1429_v50, %v1428_v51  ;;  %v925_v3 = vsel %vm598_vm3, %v4286_v37, %v924_v59  ;;  %v1965_v48 = vmul.f32 %v4331_v27, %v4331_v27  ;;  %v2267_v33 = vld [vmem:[%s4822_s5 + $0x50] sm:$0xff]  ;;  %v2268_v59 = vld [vmem:[%s4822_s5 + $0x58] sm:$0xff] }
 0x3da   : > { %v1436_v30 = vmul.f32 %v4362_v23, %v4362_v23  ;;  %v1437_v36 = vmul.f32 %v4364_v56, %v4364_v56  ;;  %v926_v32 = vsel %vm600_vm4, %v4298_v16, %v925_v3  ;;  %v1438_v44 = vmul.f32 %v4366_v35, %v4366_v35  ;;  %v2063_v3 = vld [vmem:[%s4822_s5 + $0x10] sm:$0xff] }
 0x3db   : > { %v1424_v0 = vrot.slane %v1423_v40, 1  ;;  %v1431_v2 = vrot.slane %v1430_v34, 1  ;;  %v927_v37 = vsel %vm602_vm6, %v4318_v41, %v926_v32  ;;  %v1966_v29 = vmul.f32 %v4350_v46, %v4350_v46 }
 0x3dc   : > { %v928_v26 = vsel %vm604_vm7, %v913_v12, %v927_v37  ;;  %v1976_v16 = vsel %vm596_vm2, %v4282_v1, %v4258_v49  ;;  %v1450_v28 = vsel %vm596_vm2, %v1435_v63, %v1449_v5  ;;  %v3375_v50 = vmov 0.0|0.0   ;;  %v4453_v37 = vld [vmem:[%s4822_s5 + $0x60] sm:$0xff] }
 0x3dd   : > { %v4391_v19 = vadd.f32 %v1424_v0, %v1423_v40  ;;  %v4393_v60 = vadd.f32 %v1431_v2, %v1430_v34  ;;  %v929_v6 = vsel %vm606_vm8, %v914_v11, %v928_v26  ;;  %v1977_v41 = vsel %vm598_vm3, %v4290_v45, %v1976_v16  ;;  %3044 = vmatprep.subr.bf16.mxu0 %v3375_v50  ;;  %v2061_v40 = vld [vmem:[%s4822_s5] sm:$0xff]  ;;  %v2062_v34 = vld [vmem:[%s4822_s5 + $0x8] sm:$0xff]  ;;  %v4463_v16 = vld [vmem:[%s4822_s5 + $0x70] sm:$0xff] }
 0x3de   : > { %v931_v14 = vsel %vm438_vm0, %v929_v6, 0.0  ;;  %v1978_v21 = vsel %vm600_vm4, %v4312_v9, %v1977_v41  ;;  %v1451_v17 = vsel %vm598_vm3, %v1436_v30, %v1450_v28  ;;  %v3045_v12 = vpack.c.bf16 %v2266_v43, %v2265_v57  ;;  %3032 = vmatprep.subr.bf16.mxu1 %v3375_v50  ;;  %v2064_v30 = vld [vmem:[%s4822_s5 + $0x18] sm:$0xff]  ;;  %v4458_v26 = vld [vmem:[%s4822_s5 + $0x68] sm:$0xff]  ;;  %v4473_v6 = vld [vmem:[%s4822_s5 + $0x20] sm:$0xff] }
 0x3df   : > { %932 = vadd.xlane.f32.xlu1 %v931_v14  ;;  %v1979_v49 = vsel %vm602_vm6, %v4322_v18, %v1978_v21  ;;  %v1439_v1 = vmul.f32 %v4391_v19, %v4391_v19  ;;  %v1440_v10 = vmul.f32 %v4393_v60, %v4393_v60  ;;  %v1452_v42 = vsel %vm600_vm4, %v1437_v36, %v1451_v17  ;;  %v4468_v28 = vld [vmem:[%s4822_s5 + $0x78] sm:$0xff]  ;;  %v4478_v41 = vld [vmem:[%s4822_s5 + $0x28] sm:$0xff]  ;;  %v4483_v14 = vld [vmem:[%s4822_s5 + $0x80] sm:$0xff] }
 0x3e0   : > { %v1980_v45 = vsel %vm604_vm7, %v1965_v48, %v1979_v49  ;;  %v1453_v5 = vsel %vm602_vm6, %v1438_v44, %v1452_v42  ;;  %3046 = vmatpush3.bf16.msra.mxu0 %v3045_v12  ;;  %v3048_v63 = vpack.c.bf16 %v2268_v59, %v2267_v33  ;;  %v3033_v11 = vpack.c.bf16 %v2062_v34, %v2061_v40  ;;  %v4488_v21 = vld [vmem:[%s4822_s5 + $0x88] sm:$0xff]  ;;  %v4493_v17 = vld [vmem:[%s4822_s5 + $0x30] sm:$0xff]  ;;  %v4498_v49 = vld [vmem:[%s4822_s5 + $0x38] sm:$0xff] }
 0x3e1   : > { %v1981_v9 = vsel %vm606_vm8, %v1966_v29, %v1980_v45  ;;  %v1454_v22 = vsel %vm604_vm7, %v1439_v1, %v1453_v5  ;;  %3047 = vmatprep.subr.bf16.mxu0 %v3375_v50  ;;  %v3036_v36 = vpack.c.bf16 %v2064_v30, %v2063_v3  ;;  %v3054_v42 = vpack.c.bf16 %v4468_v28, %v4463_v16 }
 0x3e2   : > { %v1983_v51 = vsel %vm438_vm0, %v1981_v9, 0.0  ;;  %v1455_v18 = vsel %vm606_vm8, %v1440_v10, %v1454_v22  ;;  %3034 = vmatpush3.bf16.msra.mxu1 %v3033_v11  ;;  %v3051_v10 = vpack.c.bf16 %v4458_v26, %v4453_v37  ;;  %v4846_v28 = vpack.c.bf16 %v4478_v41, %v4473_v6 }
 0x3e3   : > { %1984 = vadd.xlane.f32.xlu0 %v1983_v51  ;;  %v1457_v25 = vsel %vm438_vm0, %v1455_v18, 0.0  ;;  %3035 = vmatprep.subr.bf16.mxu1 %v3375_v50 }
 0x3e4   : > { %3049 = vmatpush3.bf16.msra.mxu0 %v3048_v63 }
 0x3e5   : > { %3050 = vmatprep.subr.bf16.mxu0 %v3375_v50 }
 0x3e6   : > { %3037 = vmatpush3.bf16.msra.mxu1 %v3036_v36 }
 0x3e7   : > { %1458 = vadd.xlane.f32.xlu0 %v1457_v25  ;;  %3038 = vmatprep.subr.bf16.mxu1 %v3375_v50 }
 0x46c   : > { %v933_v32 = vpop.xlane.xlu1 %932 }
 0x46d   : > { %v934_v48 = vmax.f32 %v933_v32, 1e-24 }
 0x46f   : > { %3205 = vrsqrt.f32 %v934_v48 }
 0x470   : > { %v1985_v44 = vpop.xlane.xlu0 %1984 }
 0x471   : > { %v1986_v0 = vmax.f32 %v1985_v44, 1e-24 }
 0x473   : > { %3207 = vrsqrt.f32 %v1986_v0 }
 0x474   : > { %v1459_v2 = vpop.xlane.xlu0 %1458 }
 0x475   : > { %v1460_v29 = vmax.f32 %v1459_v2, 1e-24 }
 0x477   : > { %3209 = vrsqrt.f32 %v1460_v29 }
 0x479   : > { %v3206_v1 = vpop.eup %3205 }
 0x47a   : > { %v937_v9 = vrot.slane %v3206_v1, 1  ;;  %v938_v22 = vrot.slane %v3206_v1, 2  ;;  %v939_v51 = vrot.slane %v3206_v1, 3  ;;  %v940_v18 = vrot.slane %v3206_v1, 4 }
 0x47b   : > { %v941_v25 = vrot.slane %v3206_v1, 5  ;;  %v942_v57 = vrot.slane %v3206_v1, 6  ;;  %v943_v43 = vrot.slane %v3206_v1, 7  ;;  %v4511_v12 = vmul.f32 %v3206_v1, %v4230_v54 }
 0x47c   : > { %v4514_v59 = vmul.f32 %v937_v9, %v4228_v55  ;;  %v4517_v63 = vmul.f32 %v938_v22, %v4260_v31  ;;  %v4520_v40 = vmul.f32 %v939_v51, %v4274_v24  ;;  %v4523_v11 = vmul.f32 %v940_v18, %v4292_v58 }
 0x47d   : > { %v3208_v34 = vpop.eup %3207  ;;  %v4526_v3 = vmul.f32 %v941_v25, %v4306_v62  ;;  %v4529_v30 = vmul.f32 %v942_v57, %v4324_v47  ;;  %v4532_v54 = vmul.f32 %v943_v43, %v4336_v53 }
 0x47e   : > { %v1989_v55 = vrot.slane %v3208_v34, 1  ;;  %v1990_v36 = vrot.slane %v3208_v34, 2  ;;  %v1991_v31 = vrot.slane %v3208_v34, 3  ;;  %v1992_v32 = vrot.slane %v3208_v34, 4 }
 0x47f   : > { %v1993_v48 = vrot.slane %v3208_v34, 5  ;;  %v1994_v24 = vrot.slane %v3208_v34, 6  ;;  %v1995_v44 = vrot.slane %v3208_v34, 7  ;;  %v4535_v0 = vmul.f32 %v3208_v34, %v4244_v13 }
 0x480   : > { %v4538_v58 = vmul.f32 %v1989_v55, %v4246_v61  ;;  %v4541_v62 = vmul.f32 %v1990_v36, %v4267_v38  ;;  %v4544_v47 = vmul.f32 %v1991_v31, %v4276_v39  ;;  %v4547_v53 = vmul.f32 %v1992_v32, %v4300_v20 }
 0x481   : > { %v3210_v2 = vpop.eup %3209  ;;  %v4550_v29 = vmul.f32 %v1993_v48, %v4314_v8  ;;  %v4553_v1 = vmul.f32 %v1994_v24, %v4331_v27  ;;  %v4556_v13 = vmul.f32 %v1995_v44, %v4350_v46  ;;  %v2012_v61 = vmul.f32 %v4535_v0, %v4511_v12 }
 0x482   : > { %v2013_v38 = vmul.f32 %v4538_v58, %v4514_v59  ;;  %v2014_v39 = vmul.f32 %v4541_v62, %v4517_v63  ;;  %v2015_v20 = vmul.f32 %v4544_v47, %v4520_v40  ;;  %v2016_v8 = vmul.f32 %v4547_v53, %v4523_v11 }
 0x483   : > { %v2017_v27 = vmul.f32 %v4550_v29, %v4526_v3  ;;  %v2018_v46 = vmul.f32 %v4553_v1, %v4529_v30  ;;  %v2019_v9 = vmul.f32 %v4556_v13, %v4532_v54  ;;  %v1463_v22 = vrot.slane %v3210_v2, 1 }
 0x484   : > { %v2277_v51 = vrot.slane %v2013_v38, 7  ;;  %v2279_v18 = vrot.slane %v2014_v39, 6  ;;  %v2281_v25 = vrot.slane %v2015_v20, 5  ;;  %v2283_v57 = vrot.slane %v2016_v8, 4 }
 0x485   : > { %v2285_v43 = vrot.slane %v2017_v27, 3  ;;  %v2287_v34 = vrot.slane %v2018_v46, 2  ;;  %v2289_v55 = vrot.slane %v2019_v9, 1  ;;  %v1464_v36 = vrot.slane %v3210_v2, 2 }
 0x486   : > { %v2278_v31 = vsel %vm594_vm12, %v2277_v51, %v2012_v61  ;;  %v1465_v32 = vrot.slane %v3210_v2, 3  ;;  %v1466_v48 = vrot.slane %v3210_v2, 4  ;;  %v1467_v24 = vrot.slane %v3210_v2, 5 }
 0x487   : > { %v2280_v44 = vsel %vm596_vm2, %v2279_v18, %v2278_v31  ;;  %v1468_v5 = vrot.slane %v3210_v2, 6  ;;  %v1469_v33 = vrot.slane %v3210_v2, 7  ;;  %v4577_v45 = vmul.f32 %v3210_v2, %v4340_v4 }
 0x488   : > { %v2282_v38 = vsel %vm598_vm3, %v2281_v25, %v2280_v44  ;;  %v4581_v39 = vmul.f32 %v1463_v22, %v4342_v7  ;;  %v4584_v20 = vmul.f32 %v1464_v36, %v4353_v52  ;;  %v4587_v61 = vmul.f32 %v1465_v32, %v4362_v23 }
 0x489   : > { %v2284_v8 = vsel %vm600_vm4, %v2283_v57, %v2282_v38  ;;  %v4591_v27 = vmul.f32 %v1466_v48, %v4364_v56  ;;  %v4594_v46 = vmul.f32 %v1467_v24, %v4366_v35  ;;  %v4597_v4 = vmul.f32 %v1468_v5, %v4391_v19 }
 0x48a   : > { %v2286_v7 = vsel %vm602_vm6, %v2285_v43, %v2284_v8  ;;  %v4601_v2 = vmul.f32 %v1469_v33, %v4393_v60  ;;  %v2073_v52 = vrot.slane %v4581_v39, 7  ;;  %v2075_v23 = vrot.slane %v4584_v20, 6 }
 0x48b   : > { %v2288_v9 = vsel %vm604_vm7, %v2287_v34, %v2286_v7  ;;  %v2077_v56 = vrot.slane %v4587_v61, 5  ;;  %v2079_v22 = vrot.slane %v4591_v27, 4  ;;  %v2081_v35 = vrot.slane %v4594_v46, 3 }
 0x48c   : > { %v2290_v19 = vsel %vm606_vm8, %v2289_v55, %v2288_v9  ;;  %v2074_v5 = vsel %vm594_vm12, %v2073_v52, %v4577_v45  ;;  %v2083_v60 = vrot.slane %v4597_v4, 2  ;;  %v2085_v33 = vrot.slane %v4601_v2, 1 }
 0x48d   : > { %2986 = vmatmul.mubr.msk.f32.vlgmr.msra.gmra.mrb[0].mxu0 %vm438_vm0, %v2290_v19  ;;  %v2076_v51 = vsel %vm596_vm2, %v2075_v23, %v2074_v5  ;;  %v2020_v18 = vmul.f32 %v4535_v0, %v4577_v45  ;;  %v2021_v25 = vmul.f32 %v4538_v58, %v4581_v39  ;;  %v2022_v57 = vmul.f32 %v4541_v62, %v4584_v20 }
 0x48e   : > { %3052 = vmatpush3.bf16.msra.mxu0 %v3051_v10  ;;  %v2078_v43 = vsel %vm598_vm3, %v2077_v56, %v2076_v51  ;;  %2996 = vmatprep.mubr.msk.f32.mxu0 %vm3376_vm9, %v3373_v15  ;;  %v2023_v34 = vmul.f32 %v4544_v47, %v4587_v61  ;;  %v2024_v55 = vmul.f32 %v4547_v53, %v4591_v27  ;;  %v2178_v36 = vrot.slane %v4538_v58, 7 }
 0x48f   : > { %3053 = vmatprep.subr.bf16.mxu0 %v3375_v50  ;;  %v2080_v31 = vsel %vm600_vm4, %v2079_v22, %v2078_v43  ;;  %v2025_v37 = vmul.f32 %v4550_v29, %v4594_v46  ;;  %v2026_v26 = vmul.f32 %v4553_v1, %v4597_v4  ;;  %v2027_v10 = vmul.f32 %v4556_v13, %v4601_v2  ;;  %v2465_v43 = vld [vmem:[%s4822_s5 + $0x90] sm:$0xff] }
 0x490   : > { %v2082_v32 = vsel %vm602_vm6, %v2081_v35, %v2080_v31  ;;  %v2376_v48 = vrot.slane %v2021_v25, 7  ;;  %v2378_v24 = vrot.slane %v2022_v57, 6  ;;  %v2380_v44 = vrot.slane %v2023_v34, 5  ;;  %v2466_v34 = vld [vmem:[%s4822_s5 + $0x98] sm:$0xff] }
 0x491   : > { %v2084_v38 = vsel %vm604_vm7, %v2083_v60, %v2082_v32  ;;  %v2382_v8 = vrot.slane %v2024_v55, 4  ;;  %v2384_v7 = vrot.slane %v2025_v37, 3  ;;  %v2386_v52 = vrot.slane %v2026_v26, 2 }
 0x492   : > { %3055 = vmatpush3.bf16.msra.mxu0 %v3054_v42  ;;  %v2086_v23 = vsel %vm606_vm8, %v2085_v33, %v2084_v38  ;;  %v2377_v9 = vsel %vm594_vm12, %v2376_v48, %v2020_v18  ;;  %v2388_v56 = vrot.slane %v2027_v10, 1  ;;  %v2179_v22 = vsel %vm594_vm12, %v2178_v36, %v4535_v0 }
 0x493   : > { %2964 = vmatmul.mubr.msk.f32.vlgmr.msra.gmra.mrb[0].mxu1 %vm438_vm0, %v2086_v23  ;;  %3056 = vmatprep.subr.bf16.mxu0 %v3375_v50  ;;  %v2379_v35 = vsel %vm596_vm2, %v2378_v24, %v2377_v9  ;;  %v2180_v19 = vrot.slane %v4541_v62, 6  ;;  %v2182_v5 = vrot.slane %v4544_v47, 5  ;;  %v2184_v16 = vrot.slane %v4547_v53, 4 }
 0x494   : > { %3040 = vmatpush3.bf16.msra.mxu1 %v4846_v28  ;;  %v2381_v42 = vsel %vm598_vm3, %v2380_v44, %v2379_v35  ;;  %2974 = vmatprep.mubr.msk.f32.mxu1 %vm3376_vm9, %v3373_v15  ;;  %v2186_v60 = vrot.slane %v4550_v29, 3  ;;  %v2188_v33 = vrot.slane %v4553_v1, 2  ;;  %v2190_v51 = vrot.slane %v4556_v13, 1 }
 0x495   : > { %v2383_v18 = vsel %vm600_vm4, %v2382_v8, %v2381_v42  ;;  %3041 = vmatprep.subr.bf16.mxu1 %v3375_v50  ;;  %v2181_v25 = vsel %vm596_vm2, %v2180_v19, %v2179_v22  ;;  %v2028_v6 = vsub.f32 %v4535_v0, %v4511_v12  ;;  %v2029_v41 = vsub.f32 %v4538_v58, %v4514_v59 }
 0x496   : > { %v2385_v57 = vsel %vm602_vm6, %v2384_v7, %v2383_v18  ;;  %v2183_v55 = vsel %vm598_vm3, %v2182_v5, %v2181_v25  ;;  %v2030_v36 = vsub.f32 %v4541_v62, %v4517_v63  ;;  %v2031_v12 = vsub.f32 %v4544_v47, %v4520_v40 }
 0x497   : > { %v2387_v59 = vsel %vm604_vm7, %v2386_v52, %v2385_v57  ;;  %v2185_v31 = vsel %vm600_vm4, %v2184_v16, %v2183_v55  ;;  %v2032_v37 = vsub.f32 %v4547_v53, %v4523_v11  ;;  %v2033_v26 = vsub.f32 %v4550_v29, %v4526_v3 }
 0x498   : > { %v2389_v10 = vsel %vm606_vm8, %v2388_v56, %v2387_v59  ;;  %v4847_v32 = vpack.c.bf16 %v4498_v49, %v4493_v17  ;;  %v2187_v63 = vsel %vm602_vm6, %v2186_v60, %v2185_v31  ;;  %v2034_v40 = vsub.f32 %v4553_v1, %v4529_v30  ;;  %v2562_v17 = vld [vmem:[%s4822_s5 + $0xa0] sm:$0xff]  ;;  %v2563_v49 = vld [vmem:[%s4822_s5 + $0xa8] sm:$0xff] }
 0x499   : > { %v2035_v48 = vsub.f32 %v4556_v13, %v4532_v54  ;;  %2997 = vmatmul.mubr.msk.f32.vlgmr.msra.gmra.mrb[0].mxu0 %vm438_vm0, %v2389_v10  ;;  %v3060_v11 = vpack.c.bf16 %v2466_v34, %v2465_v43  ;;  %v2189_v24 = vsel %vm604_vm7, %v2188_v33, %v2187_v63  ;;  %v2037_v3 = vand.u32 2147483647, %v2029_v41 }
 0x49a   : > { %3043 = vmatpush3.bf16.msra.mxu1 %v4847_v32  ;;  %v2038_v44 = vand.u32 2147483647, %v2030_v36  ;;  %v4848_v30 = vpack.c.bf16 %v4488_v21, %v4483_v14  ;;  %v2191_v54 = vsel %vm606_vm8, %v2190_v51, %v2189_v24  ;;  %3007 = vmatprep.mubr.msk.f32.mxu0 %vm3376_vm9, %v3373_v15  ;;  %v2039_v38 = vand.u32 2147483647, %v2031_v12  ;;  %v2664_v24 = vld [vmem:[#allocation6 + $0x10] sm:$0xff] }
 0x49b   : > { %3068 = vmatprep.subr.bf16.mxu1 %v3375_v50  ;;  %v2040_v8 = vand.u32 2147483647, %v2032_v37  ;;  %v2041_v7 = vand.u32 2147483647, %v2033_v26  ;;  %v2036_v52 = vand.u32 2147483647, %v2028_v6  ;;  %v3063_v21 = vpack.c.bf16 %v2563_v49, %v2562_v17 }
 0x49c   : > { %3058 = vmatpush3.bf16.msra.mxu0 %v4848_v30  ;;  %v2042_v23 = vand.u32 2147483647, %v2034_v40  ;;  %v2475_v9 = vrot.slane %v2037_v3, 7  ;;  %v2477_v56 = vrot.slane %v2038_v44, 6  ;;  %v2043_v22 = vand.u32 2147483647, %v2035_v48 }
 0x49d   : > { %3059 = vmatprep.subr.bf16.mxu0 %v3375_v50  ;;  %2975 = vmatmul.mubr.msk.f32.vlgmr.msra.gmra.mrb[0].mxu1 %vm438_vm0, %v2191_v54  ;;  %v2479_v35 = vrot.slane %v2039_v38, 5  ;;  %v2481_v14 = vrot.slane %v2040_v8, 4  ;;  %v2483_v5 = vrot.slane %v2041_v7, 3  ;;  %v2044_v16 = vsub.f32 %v4535_v0, %v4577_v45  ;;  %v2662_v48 = vld [vmem:[#allocation6] sm:$0xff]  ;;  %v2665_v44 = vld [vmem:[#allocation6 + $0x18] sm:$0xff] }
 0x49e   : > { %3029 = vmatprep.mubr.msk.f32.mxu1 %vm3376_vm9, %v3373_v15  ;;  %v2476_v19 = vsel %vm594_vm12, %v2475_v9, %v2036_v52  ;;  %v2045_v28 = vsub.f32 %v4538_v58, %v4581_v39  ;;  %v2046_v60 = vsub.f32 %v4541_v62, %v4584_v20  ;;  %v2047_v33 = vsub.f32 %v4544_v47, %v4587_v61  ;;  %v2907_v54 = vld [vmem:[%s4823_s6] ss:$0 sm:$0xff] }
 0x49f   : > { %v2478_v42 = vsel %vm596_vm2, %v2477_v56, %v2476_v19  ;;  %v2048_v51 = vsub.f32 %v4547_v53, %v4591_v27  ;;  %v2485_v45 = vrot.slane %v2042_v23, 2  ;;  %v2049_v0 = vsub.f32 %v4550_v29, %v4594_v46  ;;  %v2564_v53 = vld [vmem:[%s4822_s5 + $0xb0] sm:$0xff] }
 0x4a0   : > { %3061 = vmatpush3.bf16.msra.mxu0 %v3060_v11  ;;  %v2480_v18 = vsel %vm598_vm3, %v2479_v35, %v2478_v42  ;;  %v2050_v58 = vsub.f32 %v4553_v1, %v4597_v4  ;;  %v2487_v62 = vrot.slane %v2043_v22, 1  ;;  %v2053_v20 = vand.u32 2147483647, %v2045_v28  ;;  %v2565_v1 = vld [vmem:[%s4822_s5 + $0xb8] sm:$0xff]  ;;  %v2663_v11 = vld [vmem:[#allocation6 + $0x8] sm:$0xff] }
 0x4a1   : > { %3062 = vmatprep.subr.bf16.mxu0 %v3375_v50  ;;  %v2482_v39 = vsel %vm600_vm4, %v2481_v14, %v2480_v18  ;;  %v2054_v25 = vand.u32 2147483647, %v2046_v60  ;;  %v2051_v61 = vsub.f32 %v4556_v13, %v4601_v2  ;;  %v2055_v27 = vand.u32 2147483647, %v2047_v33 }
 0x4a2   : > { %v2484_v47 = vsel %vm602_vm6, %v2483_v5, %v2482_v39  ;;  %v2056_v6 = vand.u32 2147483647, %v2048_v51  ;;  %v2052_v46 = vand.u32 2147483647, %v2044_v16  ;;  %v2057_v4 = vand.u32 2147483647, %v2049_v0 }
 0x4a3   : > { %v2486_v29 = vsel %vm604_vm7, %v2485_v45, %v2484_v47  ;;  %v2574_v41 = vrot.slane %v2053_v20, 7  ;;  %v2058_v43 = vand.u32 2147483647, %v2050_v58  ;;  %v2576_v34 = vrot.slane %v2054_v25, 6 }
 0x4a4   : > { %v2488_v57 = vsel %vm606_vm8, %v2487_v62, %v2486_v29  ;;  %v2578_v13 = vrot.slane %v2055_v27, 5  ;;  %v3066_v2 = vpack.c.bf16 %v2565_v1, %v2564_v53  ;;  %v2059_v36 = vand.u32 2147483647, %v2051_v61 }
 0x4a5   : > { %3008 = vmatmul.mubr.msk.f32.vlgmr.msra.gmra.mrb[0].mxu0 %vm438_vm0, %v2488_v57  ;;  %v2575_v55 = vsel %vm594_vm12, %v2574_v41, %v2052_v46  ;;  %v2580_v59 = vrot.slane %v2056_v6, 4  ;;  %v2582_v37 = vrot.slane %v2057_v4, 3  ;;  %v2584_v10 = vrot.slane %v2058_v43, 2 }
 0x4a6   : > { %3064 = vmatpush3.bf16.msra.mxu0 %v3063_v21  ;;  %3018 = vmatprep.mubr.msk.f32.mxu0 %vm3376_vm9, %v3373_v15  ;;  %v2577_v12 = vsel %vm596_vm2, %v2576_v34, %v2575_v55  ;;  %v2586_v40 = vrot.slane %v2059_v36, 1  ;;  %v3069_v3 = vpack.c.bf16 %v2663_v11, %v2662_v48  ;;  %v3072_v17 = vpack.c.bf16 %v2665_v44, %v2664_v24 }
 0x4a7   : > { %3065 = vmatprep.subr.bf16.mxu0 %v3375_v50  ;;  %v2579_v31 = vsel %vm598_vm3, %v2578_v13, %v2577_v12 }
 0x4a8   : > { %v2581_v26 = vsel %vm600_vm4, %v2580_v59, %v2579_v31  ;;  %3070 = vmatpush3.bf16.msra.mxu1 %v3069_v3 }
 0x4a9   : > { %v2583_v32 = vsel %vm602_vm6, %v2582_v37, %v2581_v26  ;;  %3071 = vmatprep.subr.bf16.mxu1 %v3375_v50  ;;  %v2913_v50 = vld [vmem:[%s4825_s8] ss:$0 sm:$0xff] }
 0x4aa   : > { %3067 = vmatpush3.bf16.msra.mxu0 %v3066_v2  ;;  %v2585_v63 = vsel %vm604_vm7, %v2584_v10, %v2583_v32 }
 0x4ab   : > { %v2587_v15 = vsel %vm606_vm8, %v2586_v40, %v2585_v63 }
 0x4ac   : > { %3073 = vmatpush3.bf16.msra.mxu1 %v3072_v17 }
 0x4ad   : > { %3019 = vmatmul.mubr.msk.f32.vlgmr.msra.gmra.mrb[0].mxu0 %vm438_vm0, %v2587_v15 }
 0x570   : > { %v2260_v49 = vpop.f32.mrb[0].mxu1 }
 0x571   : > { %v2976_v30 = vpop.f32.mrb[1].mxu1  ;;  %v3074_v38 = vadd.f32 %v2907_v54, %v2260_v49 }
 0x580   : > { %v2656_v8 = vpop.f32.mrb[0].mxu0 }
 0x581   : > { %v3075_v7 = vadd.f32 %v3074_v38, %v2656_v8  ;;  %v3020_v52 = vpop.f32.mrb[1].mxu0 }
 0x583   : > { %3211 = vtanh.f32 %v3075_v7 }
 0x58d   : > { %v3212_v23 = vpop.eup %3211 }
 0x58e   : > { %3030 = vmatmul.mubr.msk.f32.vlgmr.msra.gmra.mrb[2].mxu1 %vm438_vm0, %v3212_v23 }
 0x661   : > { %v2742_v9 = vpop.f32.mrb[2].mxu1 }
 0x662   : > { %v2743_v56 = vadd.f32 %v2913_v50, %v2742_v9  ;;  %v3031_v22 = vpop.f32.mrb[3].mxu1 }
 0x664   : > { %3213 = vtanh.f32 %v2743_v56 }
 0x66e   : > { %v3214_v35 = vpop.eup %3213 }
 0x66f   : > { %2747 = vst [vmem:[%s399_s18] sm:$0xff] %v3214_v35 }
 0x670   : > { %3310 = shalt.err (!%p3307_p9)
}
 0x671   : > { %s3311_s10 = scalar_lea.hbm %s4773_s23, 128  ;;  %s3315_s21 = scalar_lea.hbm %s4826_s9, 256 }
 0x672   : > { %p3312_p1 = scmp.ne.s32.totalorder %s4773_s23, %s3311_s10  ;;  %p3316_p11 = scmp.lt.u32.totalorder %s4773_s23, %s4826_s9 }
 0x673   : > { %p3317_p2 = scmp.lt.u32.totalorder %s3315_s21, %s3311_s10  ;;  %p3319_p6 = scmp.lt.u32.totalorder %s3311_s10, %s4773_s23 }
 0x674   : > { %p3313_p0 = pnand %p3312_p1, %p3525_p12 }
 0x675   : > { %p3318_p4 = por %p3317_p2, %p3316_p11 }
 0x676   : > { %p3314_p5 = pneg %p3313_p0 }
 0x677   : > { %p3320_p8 = por %p3319_p6, %p3318_p4 }
 0x679   : > { %p3321_p10 = pnand %p3320_p8, %p3314_p5 }
 0x67b   : > { %3324 = shalt.err (!%p3321_p10)
}
 0x67c   : > { %3092 = dma.vmem_to_hbm [thread:$0]  (%p3525_p12), %s4775_s25, 128, %s4773_s23, %s2749_s24  }
 0x67d PF: > { %s2774_s16 = sand.u32 1, %s3355_s11   ;;  %p4849_p13 = scmp.ne.s32.totalorder %s4834_s17, 0 }
 0x67e   : > { %p4850_p3 = scmp.ge.s32.totalorder %s3367_s14, 2  ;;  %s2775_s26 = scalar_lea.sflag [#allocation5], %s2774_s16 }
 0x680   : > { %p3103_p7 = pnand %p4850_p3, %p4849_p13 }
 0x682   : > { %3350 = dma.done.wait (!%p3103_p7), %s2775_s26, 128  }
 0x683   : > { %3352 = vsyncadd (!%p3103_p7), %s2775_s26, 4294967168  ;;  %s4851_s14 = sld [smem:[#allocation12_spill]]  ;;  %s4852_s11 = smov %s3359_s12 }
 0x684   : > { %s4853_s12 = smov %s3363_s13  ;;  %s4854_s13 = smov %s3521_s28 }
 0x689   : > { %p25_p9 = scmp.ge.s32.totalorder %s4851_s14, 4  }
 0x68b   :  { %27 = sbr.rel (!%p25_p9) target bundleno = 9 (0x9), region = 111 }
 0x692   :  { %2780 = vsyncpa [#allocation4], 1 }
 0x693   :  { %2782 = vsyncpa [#allocation4 + $0x1], 1 }
 0x694   :  { %2783 = vsyncpa [#allocation7], 1 }
 0x695   :  { %2784 = vsyncpa [#allocation5], 1 }
 0x696   :  { %2786 = vsyncpa [#allocation5 + $0x1], 1 }

</bundles_post_ra>
